<compile_context>
chip_gen: v7x
topology: tpu7x:2x2x1
jax: 0.10.0
libtpu: 0.0.40
codegen_flags: <defaults>
</compile_context>

<pallas_src>
import numpy as np
import jax
import jax.numpy as jnp
from jax import lax
from jax.experimental import pallas as pl
from jax.experimental.pallas import tpu as pltpu


# Conv-tap groups: group (R4, C4) covers taps whose padded-input offset is
# (4*R4 + j, 4*C4 + i); every tap in a group reads the SAME lane window of the
# mod-4 phase decomposition (lane offset R4*RS + C4), so each group is one
# contiguous block copy into U.
_U_GROUPS = ((0, 0), (0, 1), (1, 0), (1, 1), (0, 2), (1, 2), (2, 0), (2, 1), (2, 2))


def _group_members(R4, C4):
    js = range(4) if R4 < 2 else (0,)
    is_ = range(4) if C4 < 2 else (0,)
    return [(4 * R4 + j, 4 * C4 + i) for j in js for i in is_]


def _group_phase_rows(R4, C4):
    """(start, n) sublane slice of the (20, PL) phases input, in member order."""
    if R4 < 2 and C4 < 2:
        return 0, 16          # all 16 mod-4 phases, natural (rm*4 + cm) order
    if R4 < 2:                # C4 == 2 -> phases (rm, cm=0): duplicated rows 16..19
        return 16, 4
    if C4 < 2:                # R4 == 2 -> phases (rm=0, cm=0..3): rows 0..3
        return 0, 4
    return 0, 1               # (2, 2) -> phase row 0


def _pool_terms(rs):
    """9 max-pool taps: (class index a*2+b, static lane shift dq*rs+dr, edge-mask)."""
    return (
        (0, 0,      None), (0, 1,  "B"), (0, rs, "A"), (0, rs + 1, "AB"),
        (1, 0,      None), (1, rs, "A"),
        (2, 0,      None), (2, 1,  "B"),
        (3, 0,      None),
    )


def _make_kernel(nu, cw, mw, rs):
    terms = _pool_terms(rs)
    neg = -1e30  # "excluded tap" value; never wins (tap (0,0) is always valid)

    def kernel(phases_ref, w_ref, b_ref, edge_ref, sel_ref, out_ref, u_ref):
        # ---- in-kernel im2col: 9 block copies into the shared U matrix -----
        # Zero the alignment-pad rows first (row nu-8 is overwritten below);
        # keeps the dot deterministic even though their weight columns are 0.
        u_ref[nu - 8:nu, :] = jnp.zeros((8, cw), jnp.float32)
        row = 0
        for (R4, C4) in _U_GROUPS:
            start, n = _group_phase_rows(R4, C4)
            off = R4 * rs + C4                       # static lane offset (<= 2*rs+2)
            u_ref[row:row + n, :] = phases_ref[start:start + n, off:off + cw]
            row += n                                  # ends at 81

        # ---- fused conv + bias/ReLU + MaxPool2d(3, 2, ceil_mode=True) ------
        mask_a = edge_ref[0:1, :] == 1.0              # pooled row  ph < POH-1
        mask_b = edge_ref[1:2, :] == 1.0              # pooled col  pw < POW-1
        masks = {"A": mask_a, "B": mask_b, "AB": jnp.logical_and(mask_a, mask_b)}

        m = None
        for cls, s, mk in terms:
            # One pool tap = one small matmul on a statically shifted U slice.
            z = jnp.dot(w_ref[cls], u_ref[:, s:s + mw],
                        preferred_element_type=jnp.float32)      # (48, mw)
            if mk is not None:
                z = jnp.where(masks[mk], z, neg)                  # exclude edge taps
            m = z if m is None else jnp.maximum(m, z)

        # bias & ReLU commute with the max (same bias for every tap).
        y = jnp.maximum(m + b_ref[...], 0.0)                      # (48, mw)

        # ---- lane-dense compaction: selection matmul -> 12 unmasked stores --
        out_ref[...] = jnp.dot(y, sel_ref[...],
                               preferred_element_type=jnp.float32)  # (48, 256)

    return kernel


def conv_model_forward(x, weight, bias):
    """quant(id) -> Conv2d(1,48,7,s2,p3) -> ReLU -> MaxPool2d(3,2,ceil) -> dequant(id).

    x: (N, 1, 64, 64) float32 NCHW.  Returns (N, 48, 16, 16) float32 NCHW.
    """
    N, Cin, H, W = x.shape
    assert Cin == 1 and H == 64 and W == 64, (x.shape,)
    KK, S, P = 7, 2, 3
    OH = (H + 2 * P - KK) // S + 1                 # 32
    OW = (W + 2 * P - KK) // S + 1                 # 32
    POH = -(-(OH - 3) // 2) + 1                    # 16 (ceil_mode)
    POW = -(-(OW - 3) // 2) + 1                    # 16
    assert OH == 2 * POH and OW == 2 * POW
    Cout = weight.shape[0]

    NQ, NR = POH, POW
    RS = NR + 2                                    # class-grid lane row stride (18)
    MW = NQ * RS                                   # pooled-lane span (288)
    CW = -(-(MW + RS + 2) // 128) * 128            # U width (384) >= MW + max pool shift
    NU = -(-81 // 8) * 8                           # U rows: 81 tap rows padded to 88
    PROWS = PCOLS = NQ + 2                         # 18x18 per mod-4 phase
    MAXOFF = 2 * RS + 2                            # largest group lane offset (38)
    PL = -(-(MAXOFF + CW) // 128) * 128            # padded phase row length (512)
    assert RS + 1 + MW <= CW and MAXOFF + CW <= PL  # all in-kernel slices in-bounds

    # ---- wrapper glue: mod-4 phase decomposition of the zero-padded input ----
    # TODO(synk): this pad+reshape+transpose stays as one tiny XLA fusion; a
    # lane-strided (stride-4) gather has no cheap Pallas/TPU equivalent.
    xp = jnp.pad(x[:, 0].astype(jnp.float32),
                 ((0, 0), (P, 4 * PROWS - H - P), (P, 4 * PCOLS - W - P)))  # (N,72,72)
    ph = xp.reshape(N, PROWS, 4, PCOLS, 4).transpose(0, 2, 4, 1, 3)
    ph = ph.reshape(N, 16, PROWS * PCOLS)
    ph = jnp.pad(ph, ((0, 0), (0, 0), (0, PL - PROWS * PCOLS)))
    # Duplicate phases (rm, cm=0) as rows 16..19 so every tap group is a
    # contiguous sublane slice (no strided sublane loads in-kernel).
    phases = jnp.concatenate([ph, ph[:, 0:16:4, :]], axis=1)                # (N,20,PL)

    # ---- per-class weight matrices over the shared U rows --------------------
    rcs = []
    for (R4, C4) in _U_GROUPS:
        rcs.extend(_group_members(R4, C4))                                   # 81 rows
    idx = np.full((4, NU), KK * KK, np.int32)        # KK*KK -> appended zero column
    for cls in range(4):
        a, b = divmod(cls, 2)
        for ucol, (RA, CB) in enumerate(rcs):
            kh, kw = RA - 2 * a, CB - 2 * b
            if 0 <= kh < KK and 0 <= kw < KK:
                idx[cls, ucol] = kh * KK + kw
    w_flat = jnp.concatenate(
        [weight.reshape(Cout, KK * KK).astype(jnp.float32),
         jnp.zeros((Cout, 1), jnp.float32)], axis=1)                         # (48, 50)
    w_all = jnp.transpose(w_flat[:, idx], (1, 0, 2))                         # (4,48,NU)
    b_mat = bias.reshape(Cout, 1).astype(jnp.float32)                        # (48, 1)

    # ---- compile-time constants: edge masks + 0/1 selection matrix -----------
    lane = np.arange(MW)
    edge = np.stack([(lane // RS) < (POH - 1),        # "A": pool tap row in range
                     (lane % RS) < (POW - 1)]         # "B": pool tap col in range
                    ).astype(np.float32)                                      # (2, MW)
    o = np.arange(POH * POW)
    sel = np.zeros((MW, POH * POW), np.float32)
    sel[(o // POW) * RS + (o % POW), o] = 1.0                                 # (288,256)

    n_terms = len(_pool_terms(RS))
    flops = N * 2 * Cout * (n_terms * NU * MW + MW * POH * POW)
    bytes_accessed = int(phases.size * 4 + w_all.size * 4 + sel.size * 4
                         + edge.size * 4 + N * Cout * POH * POW * 4)

    out = pl.pallas_call(
        _make_kernel(NU, CW, MW, RS),
        out_shape=jax.ShapeDtypeStruct((N, Cout, POH * POW), jnp.float32),
        grid=(N,),
        in_specs=[
            pl.BlockSpec((None, 20, PL), lambda n: (n, 0, 0)),     # per-image phases
            pl.BlockSpec((4, Cout, NU), lambda n: (0, 0, 0)),      # class weights
            pl.BlockSpec((Cout, 1), lambda n: (0, 0)),             # bias
            pl.BlockSpec((2, MW), lambda n: (0, 0)),               # edge masks
            pl.BlockSpec((MW, POH * POW), lambda n: (0, 0)),       # selection matrix
        ],
        out_specs=pl.BlockSpec((None, Cout, POH * POW), lambda n: (n, 0, 0)),
        scratch_shapes=[pltpu.VMEM((NU, CW), jnp.float32)],        # shared U matrix
        compiler_params=pltpu.CompilerParams(
            dimension_semantics=("parallel",)),
        cost_estimate=pl.CostEstimate(flops=flops, transcendentals=0,
                                      bytes_accessed=bytes_accessed),
    )(phases, w_all, b_mat, jnp.asarray(edge), jnp.asarray(sel))

    return out.reshape(N, Cout, POH, POW)


if __name__ == "__main__":
    key = jax.random.PRNGKey(0)
    kx, kw, kb = jax.random.split(key, 3)

    # Module implies (N, 1, 64, 64); batch N=2 exercises the "parallel" grid axis.
    N, H, W = 2, 64, 64
    x = jax.random.uniform(kx, (N, 1, H, W), dtype=jnp.float32)

    # Deterministic PyTorch-style U(-1/sqrt(fan_in), +1/sqrt(fan_in)) init.
    fan_in = 1 * 7 * 7
    bound = 1.0 / np.sqrt(fan_in)
    weight = jax.random.uniform(kw, (48, 1, 7, 7), jnp.float32, -bound, bound)
    bias = jax.random.uniform(kb, (48,), jnp.float32, -bound, bound)

    fwd = jax.jit(conv_model_forward)
    out = jax.block_until_ready(fwd(x, weight, bias))
    assert out.shape == (N, 48, 16, 16), out.shape

    # Reference: XLA conv + reduce_window with identical semantics.
    ref = lax.conv_general_dilated(
        x, weight, window_strides=(2, 2), padding=((3, 3), (3, 3)),
        dimension_numbers=("NCHW", "OIHW", "NCHW"),
        precision=lax.Precision.HIGHEST)
    ref = jnp.maximum(ref + bias[None, :, None, None], 0.0)
    ref = lax.reduce_window(
        ref, -jnp.inf, lax.max,
        window_dimensions=(1, 1, 3, 3), window_strides=(1, 1, 2, 2),
        padding=((0, 0), (0, 0), (0, 1), (0, 1)))   # ceil_mode edge window
    assert ref.shape == out.shape, (ref.shape, out.shape)
    np.testing.assert_allclose(np.asarray(out), np.asarray(ref),
                               rtol=2e-2, atol=2e-2)

    print("KERNEL_OK")
</pallas_src>

<mosaic_0001>
module attributes {stable_mosaic.version = 11 : i64} {
  func.func @kernel(%arg0: i32, %arg1: memref<1x20x512xf32, #tpu.memory_space<vmem>>, %arg2: memref<4x48x88xf32, #tpu.memory_space<vmem>>, %arg3: memref<48x1xf32, #tpu.memory_space<vmem>>, %arg4: memref<2x288xf32, #tpu.memory_space<vmem>>, %arg5: memref<288x256xf32, #tpu.memory_space<vmem>>, %arg6: memref<1x48x256xf32, #tpu.memory_space<vmem>>, %arg7: memref<88x384xf32, #tpu.memory_space<vmem>>) attributes {dimension_semantics = [#tpu.dimension_semantics<parallel>], iteration_bounds = array<i64: 2>, scalar_prefetch = 0 : i64, scratch_operands = 1 : i64, tpu.core_type = #tpu.core_type<tc>, window_params = [{transform_indices = @transform_0, window_bounds = array<i64: 1, 20, 512>}, {pipeline_mode = #tpu.pipeline_mode<synchronous>, transform_indices = @transform_1, window_bounds = array<i64: 4, 48, 88>}, {pipeline_mode = #tpu.pipeline_mode<synchronous>, transform_indices = @transform_2, window_bounds = array<i64: 48, 1>}, {pipeline_mode = #tpu.pipeline_mode<synchronous>, transform_indices = @transform_3, window_bounds = array<i64: 2, 288>}, {pipeline_mode = #tpu.pipeline_mode<synchronous>, transform_indices = @transform_4, window_bounds = array<i64: 288, 256>}, {transform_indices = @transform_5, window_bounds = array<i64: 1, 48, 256>}]} {
    %cst = arith.constant 0.000000e+00 : f32
    %0 = vector.broadcast %cst : f32 to vector<8x384xf32>
    %c80 = arith.constant 80 : index
    %c0 = arith.constant 0 : index
    %1 = vector.load %arg7[%c80, %c0] : memref<88x384xf32, #tpu.memory_space<vmem>>, vector<8x384xf32>
    tpu.vector_store %arg7[%c80, %c0], %0 {strides = array<i32>} : memref<88x384xf32, #tpu.memory_space<vmem>>, vector<8x384xf32>,
    %c0_0 = arith.constant 0 : index
    %c0_1 = arith.constant 0 : index
    %c0_2 = arith.constant 0 : index
    %2 = vector.load %arg1[%c0_0, %c0_1, %c0_2] : memref<1x20x512xf32, #tpu.memory_space<vmem>>, vector<1x16x384xf32>
    %3 = vector.shape_cast %2 : vector<1x16x384xf32> to vector<16x384xf32>
    %c0_3 = arith.constant 0 : index
    %c0_4 = arith.constant 0 : index
    %4 = vector.load %arg7[%c0_3, %c0_4] : memref<88x384xf32, #tpu.memory_space<vmem>>, vector<16x384xf32>
    tpu.vector_store %arg7[%c0_3, %c0_4], %3 {strides = array<i32>} : memref<88x384xf32, #tpu.memory_space<vmem>>, vector<16x384xf32>,
    %c0_5 = arith.constant 0 : index
    %c0_6 = arith.constant 0 : index
    %c1 = arith.constant 1 : index
    %5 = vector.load %arg1[%c0_5, %c0_6, %c1] : memref<1x20x512xf32, #tpu.memory_space<vmem>>, vector<1x16x384xf32>
    %6 = vector.shape_cast %5 : vector<1x16x384xf32> to vector<16x384xf32>
    %c16 = arith.constant 16 : index
    %c0_7 = arith.constant 0 : index
    %7 = vector.load %arg7[%c16, %c0_7] : memref<88x384xf32, #tpu.memory_space<vmem>>, vector<16x384xf32>
    tpu.vector_store %arg7[%c16, %c0_7], %6 {strides = array<i32>} : memref<88x384xf32, #tpu.memory_space<vmem>>, vector<16x384xf32>,
    %c0_8 = arith.constant 0 : index
    %c0_9 = arith.constant 0 : index
    %c18 = arith.constant 18 : index
    %8 = vector.load %arg1[%c0_8, %c0_9, %c18] : memref<1x20x512xf32, #tpu.memory_space<vmem>>, vector<1x16x384xf32>
    %9 = vector.shape_cast %8 : vector<1x16x384xf32> to vector<16x384xf32>
    %c32 = arith.constant 32 : index
    %c0_10 = arith.constant 0 : index
    %10 = vector.load %arg7[%c32, %c0_10] : memref<88x384xf32, #tpu.memory_space<vmem>>, vector<16x384xf32>
    tpu.vector_store %arg7[%c32, %c0_10], %9 {strides = array<i32>} : memref<88x384xf32, #tpu.memory_space<vmem>>, vector<16x384xf32>,
    %c0_11 = arith.constant 0 : index
    %c0_12 = arith.constant 0 : index
    %c19 = arith.constant 19 : index
    %11 = vector.load %arg1[%c0_11, %c0_12, %c19] : memref<1x20x512xf32, #tpu.memory_space<vmem>>, vector<1x16x384xf32>
    %12 = vector.shape_cast %11 : vector<1x16x384xf32> to vector<16x384xf32>
    %c48 = arith.constant 48 : index
    %c0_13 = arith.constant 0 : index
    %13 = vector.load %arg7[%c48, %c0_13] : memref<88x384xf32, #tpu.memory_space<vmem>>, vector<16x384xf32>
    tpu.vector_store %arg7[%c48, %c0_13], %12 {strides = array<i32>} : memref<88x384xf32, #tpu.memory_space<vmem>>, vector<16x384xf32>,
    %c0_14 = arith.constant 0 : index
    %c16_15 = arith.constant 16 : index
    %c2 = arith.constant 2 : index
    %14 = vector.load %arg1[%c0_14, %c16_15, %c2] : memref<1x20x512xf32, #tpu.memory_space<vmem>>, vector<1x4x384xf32>
    %15 = vector.shape_cast %14 : vector<1x4x384xf32> to vector<4x384xf32>
    %c64 = arith.constant 64 : index
    %c0_16 = arith.constant 0 : index
    %16 = vector.load %arg7[%c64, %c0_16] : memref<88x384xf32, #tpu.memory_space<vmem>>, vector<4x384xf32>
    tpu.vector_store %arg7[%c64, %c0_16], %15 {strides = array<i32>} : memref<88x384xf32, #tpu.memory_space<vmem>>, vector<4x384xf32>,
    %c0_17 = arith.constant 0 : index
    %c16_18 = arith.constant 16 : index
    %c20 = arith.constant 20 : index
    %17 = vector.load %arg1[%c0_17, %c16_18, %c20] : memref<1x20x512xf32, #tpu.memory_space<vmem>>, vector<1x4x384xf32>
    %18 = vector.shape_cast %17 : vector<1x4x384xf32> to vector<4x384xf32>
    %c68 = arith.constant 68 : index
    %c0_19 = arith.constant 0 : index
    %19 = vector.load %arg7[%c68, %c0_19] : memref<88x384xf32, #tpu.memory_space<vmem>>, vector<4x384xf32>
    tpu.vector_store %arg7[%c68, %c0_19], %18 {strides = array<i32>} : memref<88x384xf32, #tpu.memory_space<vmem>>, vector<4x384xf32>,
    %c0_20 = arith.constant 0 : index
    %c0_21 = arith.constant 0 : index
    %c36 = arith.constant 36 : index
    %20 = vector.load %arg1[%c0_20, %c0_21, %c36] : memref<1x20x512xf32, #tpu.memory_space<vmem>>, vector<1x4x384xf32>
    %21 = vector.shape_cast %20 : vector<1x4x384xf32> to vector<4x384xf32>
    %c72 = arith.constant 72 : index
    %c0_22 = arith.constant 0 : index
    %22 = vector.load %arg7[%c72, %c0_22] : memref<88x384xf32, #tpu.memory_space<vmem>>, vector<4x384xf32>
    tpu.vector_store %arg7[%c72, %c0_22], %21 {strides = array<i32>} : memref<88x384xf32, #tpu.memory_space<vmem>>, vector<4x384xf32>,
    %c0_23 = arith.constant 0 : index
    %c0_24 = arith.constant 0 : index
    %c37 = arith.constant 37 : index
    %23 = vector.load %arg1[%c0_23, %c0_24, %c37] : memref<1x20x512xf32, #tpu.memory_space<vmem>>, vector<1x4x384xf32>
    %24 = vector.shape_cast %23 : vector<1x4x384xf32> to vector<4x384xf32>
    %c76 = arith.constant 76 : index
    %c0_25 = arith.constant 0 : index
    %25 = vector.load %arg7[%c76, %c0_25] : memref<88x384xf32, #tpu.memory_space<vmem>>, vector<4x384xf32>
    tpu.vector_store %arg7[%c76, %c0_25], %24 {strides = array<i32>} : memref<88x384xf32, #tpu.memory_space<vmem>>, vector<4x384xf32>,
    %c0_26 = arith.constant 0 : index
    %c0_27 = arith.constant 0 : index
    %c38 = arith.constant 38 : index
    %26 = vector.load %arg1[%c0_26, %c0_27, %c38] : memref<1x20x512xf32, #tpu.memory_space<vmem>>, vector<1x1x384xf32>
    %27 = vector.shape_cast %26 : vector<1x1x384xf32> to vector<1x384xf32>
    %c80_28 = arith.constant 80 : index
    %c0_29 = arith.constant 0 : index
    %28 = vector.load %arg7[%c80_28, %c0_29] : memref<88x384xf32, #tpu.memory_space<vmem>>, vector<1x384xf32>
    tpu.vector_store %arg7[%c80_28, %c0_29], %27 {strides = array<i32>} : memref<88x384xf32, #tpu.memory_space<vmem>>, vector<1x384xf32>,
    %c0_30 = arith.constant 0 : index
    %c0_31 = arith.constant 0 : index
    %29 = vector.load %arg4[%c0_30, %c0_31] : memref<2x288xf32, #tpu.memory_space<vmem>>, vector<1x288xf32>
    %cst_32 = arith.constant 1.000000e+00 : f32
    %30 = vector.broadcast %cst_32 : f32 to vector<1x288xf32>
    %31 = arith.cmpf oeq, %29, %30 : vector<1x288xf32>
    %c1_33 = arith.constant 1 : index
    %c0_34 = arith.constant 0 : index
    %32 = vector.load %arg4[%c1_33, %c0_34] : memref<2x288xf32, #tpu.memory_space<vmem>>, vector<1x288xf32>
    %cst_35 = arith.constant 1.000000e+00 : f32
    %33 = vector.broadcast %cst_35 : f32 to vector<1x288xf32>
    %34 = arith.cmpf oeq, %32, %33 : vector<1x288xf32>
    %35 = arith.andi %31, %34 : vector<1x288xi1>
    %c0_36 = arith.constant 0 : index
    %c0_37 = arith.constant 0 : index
    %c0_38 = arith.constant 0 : index
    %36 = vector.load %arg2[%c0_36, %c0_37, %c0_38] : memref<4x48x88xf32, #tpu.memory_space<vmem>>, vector<1x48x88xf32>
    %37 = vector.shape_cast %36 : vector<1x48x88xf32> to vector<48x88xf32>
    %c0_39 = arith.constant 0 : index
    %c0_40 = arith.constant 0 : index
    %38 = vector.load %arg7[%c0_39, %c0_40] : memref<88x384xf32, #tpu.memory_space<vmem>>, vector<88x288xf32>
    %cst_41 = arith.constant dense<0.000000e+00> : vector<48x288xf32>
    %39 = tpu.matmul %37, %38, %cst_41 {dimension_numbers = #tpu.dot_dimension_numbers<[1], [0], [0], [1], [0, 0, 1, 1], [], []>} : vector<48x88xf32>, vector<88x288xf32>, vector<48x288xf32> -> vector<48x288xf32>
    %c0_42 = arith.constant 0 : index
    %c0_43 = arith.constant 0 : index
    %c0_44 = arith.constant 0 : index
    %40 = vector.load %arg2[%c0_42, %c0_43, %c0_44] : memref<4x48x88xf32, #tpu.memory_space<vmem>>, vector<1x48x88xf32>
    %41 = vector.shape_cast %40 : vector<1x48x88xf32> to vector<48x88xf32>
    %c0_45 = arith.constant 0 : index
    %c1_46 = arith.constant 1 : index
    %42 = vector.load %arg7[%c0_45, %c1_46] : memref<88x384xf32, #tpu.memory_space<vmem>>, vector<88x288xf32>
    %cst_47 = arith.constant dense<0.000000e+00> : vector<48x288xf32>
    %43 = tpu.matmul %41, %42, %cst_47 {dimension_numbers = #tpu.dot_dimension_numbers<[1], [0], [0], [1], [0, 0, 1, 1], [], []>} : vector<48x88xf32>, vector<88x288xf32>, vector<48x288xf32> -> vector<48x288xf32>
    %cst_48 = arith.constant -1.000000e+30 : f32
    %44 = vector.shape_cast %34 : vector<1x288xi1> to vector<1x288xi1>
    %45 = vector.broadcast %44 : vector<1x288xi1> to vector<48x288xi1>
    %46 = vector.broadcast %cst_48 : f32 to vector<48x288xf32>
    %47 = arith.select %45, %43, %46 : vector<48x288xi1>, vector<48x288xf32>
    %48 = arith.maximumf %39, %47 : vector<48x288xf32>
    %c0_49 = arith.constant 0 : index
    %c0_50 = arith.constant 0 : index
    %c0_51 = arith.constant 0 : index
    %49 = vector.load %arg2[%c0_49, %c0_50, %c0_51] : memref<4x48x88xf32, #tpu.memory_space<vmem>>, vector<1x48x88xf32>
    %50 = vector.shape_cast %49 : vector<1x48x88xf32> to vector<48x88xf32>
    %c0_52 = arith.constant 0 : index
    %c18_53 = arith.constant 18 : index
    %51 = vector.load %arg7[%c0_52, %c18_53] : memref<88x384xf32, #tpu.memory_space<vmem>>, vector<88x288xf32>
    %cst_54 = arith.constant dense<0.000000e+00> : vector<48x288xf32>
    %52 = tpu.matmul %50, %51, %cst_54 {dimension_numbers = #tpu.dot_dimension_numbers<[1], [0], [0], [1], [0, 0, 1, 1], [], []>} : vector<48x88xf32>, vector<88x288xf32>, vector<48x288xf32> -> vector<48x288xf32>
    %cst_55 = arith.constant -1.000000e+30 : f32
    %53 = vector.shape_cast %31 : vector<1x288xi1> to vector<1x288xi1>
    %54 = vector.broadcast %53 : vector<1x288xi1> to vector<48x288xi1>
    %55 = vector.broadcast %cst_55 : f32 to vector<48x288xf32>
    %56 = arith.select %54, %52, %55 : vector<48x288xi1>, vector<48x288xf32>
    %57 = arith.maximumf %48, %56 : vector<48x288xf32>
    %c0_56 = arith.constant 0 : index
    %c0_57 = arith.constant 0 : index
    %c0_58 = arith.constant 0 : index
    %58 = vector.load %arg2[%c0_56, %c0_57, %c0_58] : memref<4x48x88xf32, #tpu.memory_space<vmem>>, vector<1x48x88xf32>
    %59 = vector.shape_cast %58 : vector<1x48x88xf32> to vector<48x88xf32>
    %c0_59 = arith.constant 0 : index
    %c19_60 = arith.constant 19 : index
    %60 = vector.load %arg7[%c0_59, %c19_60] : memref<88x384xf32, #tpu.memory_space<vmem>>, vector<88x288xf32>
    %cst_61 = arith.constant dense<0.000000e+00> : vector<48x288xf32>
    %61 = tpu.matmul %59, %60, %cst_61 {dimension_numbers = #tpu.dot_dimension_numbers<[1], [0], [0], [1], [0, 0, 1, 1], [], []>} : vector<48x88xf32>, vector<88x288xf32>, vector<48x288xf32> -> vector<48x288xf32>
    %cst_62 = arith.constant -1.000000e+30 : f32
    %62 = vector.shape_cast %35 : vector<1x288xi1> to vector<1x288xi1>
    %63 = vector.broadcast %62 : vector<1x288xi1> to vector<48x288xi1>
    %64 = vector.broadcast %cst_62 : f32 to vector<48x288xf32>
    %65 = arith.select %63, %61, %64 : vector<48x288xi1>, vector<48x288xf32>
    %66 = arith.maximumf %57, %65 : vector<48x288xf32>
    %c1_63 = arith.constant 1 : index
    %c0_64 = arith.constant 0 : index
    %c0_65 = arith.constant 0 : index
    %67 = vector.load %arg2[%c1_63, %c0_64, %c0_65] : memref<4x48x88xf32, #tpu.memory_space<vmem>>, vector<1x48x88xf32>
    %68 = vector.shape_cast %67 : vector<1x48x88xf32> to vector<48x88xf32>
    %c0_66 = arith.constant 0 : index
    %c0_67 = arith.constant 0 : index
    %69 = vector.load %arg7[%c0_66, %c0_67] : memref<88x384xf32, #tpu.memory_space<vmem>>, vector<88x288xf32>
    %cst_68 = arith.constant dense<0.000000e+00> : vector<48x288xf32>
    %70 = tpu.matmul %68, %69, %cst_68 {dimension_numbers = #tpu.dot_dimension_numbers<[1], [0], [0], [1], [0, 0, 1, 1], [], []>} : vector<48x88xf32>, vector<88x288xf32>, vector<48x288xf32> -> vector<48x288xf32>
    %71 = arith.maximumf %66, %70 : vector<48x288xf32>
    %c1_69 = arith.constant 1 : index
    %c0_70 = arith.constant 0 : index
    %c0_71 = arith.constant 0 : index
    %72 = vector.load %arg2[%c1_69, %c0_70, %c0_71] : memref<4x48x88xf32, #tpu.memory_space<vmem>>, vector<1x48x88xf32>
    %73 = vector.shape_cast %72 : vector<1x48x88xf32> to vector<48x88xf32>
    %c0_72 = arith.constant 0 : index
    %c18_73 = arith.constant 18 : index
    %74 = vector.load %arg7[%c0_72, %c18_73] : memref<88x384xf32, #tpu.memory_space<vmem>>, vector<88x288xf32>
    %cst_74 = arith.constant dense<0.000000e+00> : vector<48x288xf32>
    %75 = tpu.matmul %73, %74, %cst_74 {dimension_numbers = #tpu.dot_dimension_numbers<[1], [0], [0], [1], [0, 0, 1, 1], [], []>} : vector<48x88xf32>, vector<88x288xf32>, vector<48x288xf32> -> vector<48x288xf32>
    %cst_75 = arith.constant -1.000000e+30 : f32
    %76 = vector.shape_cast %31 : vector<1x288xi1> to vector<1x288xi1>
    %77 = vector.broadcast %76 : vector<1x288xi1> to vector<48x288xi1>
    %78 = vector.broadcast %cst_75 : f32 to vector<48x288xf32>
    %79 = arith.select %77, %75, %78 : vector<48x288xi1>, vector<48x288xf32>
    %80 = arith.maximumf %71, %79 : vector<48x288xf32>
    %c2_76 = arith.constant 2 : index
    %c0_77 = arith.constant 0 : index
    %c0_78 = arith.constant 0 : index
    %81 = vector.load %arg2[%c2_76, %c0_77, %c0_78] : memref<4x48x88xf32, #tpu.memory_space<vmem>>, vector<1x48x88xf32>
    %82 = vector.shape_cast %81 : vector<1x48x88xf32> to vector<48x88xf32>
    %c0_79 = arith.constant 0 : index
    %c0_80 = arith.constant 0 : index
    %83 = vector.load %arg7[%c0_79, %c0_80] : memref<88x384xf32, #tpu.memory_space<vmem>>, vector<88x288xf32>
    %cst_81 = arith.constant dense<0.000000e+00> : vector<48x288xf32>
    %84 = tpu.matmul %82, %83, %cst_81 {dimension_numbers = #tpu.dot_dimension_numbers<[1], [0], [0], [1], [0, 0, 1, 1], [], []>} : vector<48x88xf32>, vector<88x288xf32>, vector<48x288xf32> -> vector<48x288xf32>
    %85 = arith.maximumf %80, %84 : vector<48x288xf32>
    %c2_82 = arith.constant 2 : index
    %c0_83 = arith.constant 0 : index
    %c0_84 = arith.constant 0 : index
    %86 = vector.load %arg2[%c2_82, %c0_83, %c0_84] : memref<4x48x88xf32, #tpu.memory_space<vmem>>, vector<1x48x88xf32>
    %87 = vector.shape_cast %86 : vector<1x48x88xf32> to vector<48x88xf32>
    %c0_85 = arith.constant 0 : index
    %c1_86 = arith.constant 1 : index
    %88 = vector.load %arg7[%c0_85, %c1_86] : memref<88x384xf32, #tpu.memory_space<vmem>>, vector<88x288xf32>
    %cst_87 = arith.constant dense<0.000000e+00> : vector<48x288xf32>
    %89 = tpu.matmul %87, %88, %cst_87 {dimension_numbers = #tpu.dot_dimension_numbers<[1], [0], [0], [1], [0, 0, 1, 1], [], []>} : vector<48x88xf32>, vector<88x288xf32>, vector<48x288xf32> -> vector<48x288xf32>
    %cst_88 = arith.constant -1.000000e+30 : f32
    %90 = vector.shape_cast %34 : vector<1x288xi1> to vector<1x288xi1>
    %91 = vector.broadcast %90 : vector<1x288xi1> to vector<48x288xi1>
    %92 = vector.broadcast %cst_88 : f32 to vector<48x288xf32>
    %93 = arith.select %91, %89, %92 : vector<48x288xi1>, vector<48x288xf32>
    %94 = arith.maximumf %85, %93 : vector<48x288xf32>
    %c3 = arith.constant 3 : index
    %c0_89 = arith.constant 0 : index
    %c0_90 = arith.constant 0 : index
    %95 = vector.load %arg2[%c3, %c0_89, %c0_90] : memref<4x48x88xf32, #tpu.memory_space<vmem>>, vector<1x48x88xf32>
    %96 = vector.shape_cast %95 : vector<1x48x88xf32> to vector<48x88xf32>
    %c0_91 = arith.constant 0 : index
    %c0_92 = arith.constant 0 : index
    %97 = vector.load %arg7[%c0_91, %c0_92] : memref<88x384xf32, #tpu.memory_space<vmem>>, vector<88x288xf32>
    %cst_93 = arith.constant dense<0.000000e+00> : vector<48x288xf32>
    %98 = tpu.matmul %96, %97, %cst_93 {dimension_numbers = #tpu.dot_dimension_numbers<[1], [0], [0], [1], [0, 0, 1, 1], [], []>} : vector<48x88xf32>, vector<88x288xf32>, vector<48x288xf32> -> vector<48x288xf32>
    %99 = arith.maximumf %94, %98 : vector<48x288xf32>
    %c0_94 = arith.constant 0 : index
    %c0_95 = arith.constant 0 : index
    %100 = vector.load %arg3[%c0_94, %c0_95] : memref<48x1xf32, #tpu.memory_space<vmem>>, vector<48x1xf32>
    %101 = vector.broadcast %100 : vector<48x1xf32> to vector<48x288xf32>
    %102 = arith.addf %99, %101 : vector<48x288xf32>
    %cst_96 = arith.constant 0.000000e+00 : f32
    %103 = vector.broadcast %cst_96 : f32 to vector<48x288xf32>
    %104 = arith.maximumf %102, %103 : vector<48x288xf32>
    %c0_97 = arith.constant 0 : index
    %c0_98 = arith.constant 0 : index
    %105 = vector.load %arg5[%c0_97, %c0_98] : memref<288x256xf32, #tpu.memory_space<vmem>>, vector<288x256xf32>
    %cst_99 = arith.constant dense<0.000000e+00> : vector<48x256xf32>
    %106 = tpu.matmul %104, %105, %cst_99 {dimension_numbers = #tpu.dot_dimension_numbers<[1], [0], [0], [1], [0, 0, 1, 1], [], []>} : vector<48x288xf32>, vector<288x256xf32>, vector<48x256xf32> -> vector<48x256xf32>
    %c0_100 = arith.constant 0 : index
    %c0_101 = arith.constant 0 : index
    %c0_102 = arith.constant 0 : index
    %107 = vector.load %arg6[%c0_100, %c0_101, %c0_102] : memref<1x48x256xf32, #tpu.memory_space<vmem>>, vector<1x48x256xf32>
    %108 = vector.shape_cast %107 : vector<1x48x256xf32> to vector<48x256xf32>
    %109 = vector.shape_cast %106 : vector<48x256xf32> to vector<1x48x256xf32>
    tpu.vector_store %arg6[%c0_100, %c0_101, %c0_102], %109 {strides = array<i32>} : memref<1x48x256xf32, #tpu.memory_space<vmem>>, vector<1x48x256xf32>,
    return
  }
  func.func @transform_0(%arg0: i32) -> (i32, i32, i32) {
    %c0_i32 = arith.constant 0 : i32
    %c0_i32_0 = arith.constant 0 : i32
    %c0_i32_1 = arith.constant 0 : i32
    return %arg0, %c0_i32, %c0_i32_0 : i32, i32, i32
  }
  func.func @transform_1(%arg0: i32) -> (i32, i32, i32) {
    %c0_i32 = arith.constant 0 : i32
    %c0_i32_0 = arith.constant 0 : i32
    %c0_i32_1 = arith.constant 0 : i32
    %c0_i32_2 = arith.constant 0 : i32
    return %c0_i32, %c0_i32_0, %c0_i32_1 : i32, i32, i32
  }
  func.func @transform_2(%arg0: i32) -> (i32, i32) {
    %c0_i32 = arith.constant 0 : i32
    %c0_i32_0 = arith.constant 0 : i32
    %c0_i32_1 = arith.constant 0 : i32
    return %c0_i32, %c0_i32_0 : i32, i32
  }
  func.func @transform_3(%arg0: i32) -> (i32, i32) {
    %c0_i32 = arith.constant 0 : i32
    %c0_i32_0 = arith.constant 0 : i32
    %c0_i32_1 = arith.constant 0 : i32
    return %c0_i32, %c0_i32_0 : i32, i32
  }
  func.func @transform_4(%arg0: i32) -> (i32, i32) {
    %c0_i32 = arith.constant 0 : i32
    %c0_i32_0 = arith.constant 0 : i32
    %c0_i32_1 = arith.constant 0 : i32
    return %c0_i32, %c0_i32_0 : i32, i32
  }
  func.func @transform_5(%arg0: i32) -> (i32, i32, i32) {
    %c0_i32 = arith.constant 0 : i32
    %c0_i32_0 = arith.constant 0 : i32
    %c0_i32_1 = arith.constant 0 : i32
    return %arg0, %c0_i32, %c0_i32_0 : i32, i32, i32
  }
}

</mosaic_0001>

<bundles_post_ra>
// kernel: conv_model_forward.1
= control target key start
LH: loop header
LB: loop body
LE: loop exit
PB: predicated region body
PF: predicated region fallthrough
CT: control target
= control target key end

     0   :  { %s4849_s18 = smov 0   ;;  %s7092_s0 = inlined_call_operand.vmem [shape: f32[2,20,512], index: 0, kind: input, shape index: {}]   ;;  %s7093_s1 = inlined_call_operand.vmem [shape: f32[4,48,88], index: 1, kind: input, shape index: {}]   ;;  %s7094_s2 = inlined_call_operand.vmem [shape: f32[48,1], index: 2, kind: input, shape index: {}]   ;;  %s7095_s3 = inlined_call_operand.vmem [shape: f32[2,288], index: 3, kind: input, shape index: {}]   ;;  %s7096_s4 = inlined_call_operand.vmem [shape: f32[288,256], index: 4, kind: input, shape index: {}]   ;;  %s7097_s5 = inlined_call_operand.vmem [shape: f32[2,48,256], index: 5, kind: output, shape index: {}]  }
   0x1 LB: > { %s3533_s19 = sadd.s32 4294967295, %s4807_s18   ;;  %p3537_p0 = scmp.ge.s32.totalorder %s4807_s18, 1  ;;  %s4807_s18 = sphi %s4849_s18, %s15_s18  }
   0x2   : > { %p187_p1 = scmp.lt.s32.totalorder %s4807_s18, 3 }
   0x4   : > { %p188_p2 = pnand %p3537_p0, %p187_p1 }
   0x6   : > { %191 = sbr.rel (%p188_p2) target bundleno = 993 (0x3e1), region = 40 }
   0xd   : > { %p215_p3 = scmp.lt.s32.totalorder %s3533_s19, 1  ;;  %s4809_s24 = smov 127   ;;  %v7113_v30 = vmov 0.0   ;;  %v4966_v39 = vld [vmem:[%s7093_s1] sm:$0xff]  ;;  %vm565_vm0 = vcmask 719872   ;;  %vm272_vm1 = vcmask 1039360  }
   0xe   : > { %s4810_s25 = smov 110   ;;  %s4811_s26 = smov 109   ;;  %225 = vst [vmem:[#allocation2 + $0xf0] sm:$0xff] %v7113_v30  ;;  %226 = vst [vmem:[#allocation2 + $0xf8] sm:$0xff] %v7113_v30  ;;  %648 = vmatprep.mubr.f32.mxu1 %v7113_v30  ;;  %3881 = vmatprep.mubr.msk.f32.mxu0 %vm565_vm0, %v4966_v39  ;;  %vm323_vm2 = vcmask 900096   ;;  %vm374_vm3 = vcmask 891904  }
   0xf   : > { %s7245_s19 = smov (!%p215_p3, %s3533_s19), 1  ;;  %s4812_s27 = smov 126   ;;  %227 = vst [vmem:[#allocation2 + $0x100] sm:$0xff] %v7113_v30  ;;  %vm409_vm4 = vcmask 1031168   ;;  %vm439_vm5 = vcmask 883712   ;;  %vm465_vm6 = vcmask 752640  }
  0x10   : > { %s4551_s20 = smul.u32 96, %s7245_s19  ;;  %s4813_s28 = smov 108   ;;  %vm495_vm7 = vcmask 744448   ;;  %vm510_vm8 = vcmask 736256  }
  0x11   : > { %s4814_s29 = smov 92   ;;  %s4815_s30 = smov 91  }
  0x12   : > { %s4865_s23 = scalar_lea.vmem %s7092_s0, %s4551_s20  ;;  %s4817_s6 = smov 90  }
  0x13   : > { %v243_v0 = vld [vmem:[%s4865_s23 + $0x18] sm:$0xff]  ;;  %v4869_v1 = vld [vmem:[%s4865_s23 + $0x8] sm:$0xff]  ;;  %v4878_v3 = vld [vmem:[%s4865_s23 + $0x10] sm:$0xff] }
  0x14   : > { %v4872_v2 = vld [vmem:[%s4865_s23 + $0x28] sm:$0xff]  ;;  %262 = vrot.lane.b32.xlu1 %v243_v0, %s4809_s24  ;;  %258 = vrot.lane.b32.xlu0 %v4869_v1, %s4809_s24  ;;  %v4885_v5 = vld [vmem:[%s4865_s23 + $0x30] sm:$0xff]  ;;  %v4570_v36 = vpack.i.bf16 %v4878_v3, %v4869_v1 }
  0x15   : > { %v4882_v4 = vpack.c.bf16 %v4872_v2, %v4869_v1  ;;  %v244_v6 = vld [vmem:[%s4865_s23 + $0x20] sm:$0xff]  ;;  %v247_v10 = vld [vmem:[%s4865_s23 + $0x38] sm:$0xff]  ;;  %v395_v11 = vld [vmem:[%s4865_s23 + $0x50] sm:$0xf]  ;;  %v4575_v38 = vpack.i.bf16 %v4885_v5, %v4872_v2 }
  0x16   : > { %v240_v7 = vld [vmem:[%s4865_s23] sm:$0xff]  ;;  %v394_v12 = vld [vmem:[%s4865_s23 + $0x48] sm:$0xf]  ;;  %v396_v15 = vld [vmem:[%s4865_s23 + $0x58] sm:$0xf] }
  0x17   : > { %v4889_v8 = vpack.i.bf16 %v244_v6, %v240_v7  ;;  %4108 = vmatprep.subr.bf16.mxu1 %v4882_v4  ;;  %v4892_v9 = vpack.c.bf16 %v244_v6, %v240_v7  ;;  %v420_v13 = vld [vmem:[%s4865_s23 + $0x48] sm:$0xf]  ;;  %v422_v16 = vld [vmem:[%s4865_s23 + $0x58] sm:$0xf]  ;;  %v421_v17 = vld [vmem:[%s4865_s23 + $0x50] sm:$0xf] }
  0x18   : > { %266 = vrot.lane.b32.xlu1 %v4872_v2, %s4809_s24  ;;  %260 = vrot.lane.b32.xlu0 %v4878_v3, %s4809_s24  ;;  %v428_v14 = vrot.slane %v420_v13, 4  ;;  %v430_v18 = vrot.slane %v422_v16, 4  ;;  %v429_v19 = vrot.slane %v421_v17, 4  ;;  %v451_v20 = vld [vmem:[%s4865_s23 + $0x10] sm:$0xf] }
  0x19   : > { %4110 = vmatpush1.bf16.msra.mxu1 %v4892_v9  ;;  %v450_v21 = vld [vmem:[%s4865_s23 + $0x8] sm:$0xf]  ;;  %v452_v24 = vld [vmem:[%s4865_s23 + $0x18] sm:$0xf]  ;;  %v477_v26 = vld [vmem:[%s4865_s23 + $0x10] sm:$0xf] }
  0x1a   : > { %v476_v22 = vld [vmem:[%s4865_s23 + $0x8] sm:$0xf]  ;;  %v478_v25 = vld [vmem:[%s4865_s23 + $0x18] sm:$0xf]  ;;  %v485_v28 = vrot.slane %v477_v26, 4 }
  0x1b   : > { %v484_v23 = vrot.slane %v476_v22, 4  ;;  %v486_v27 = vrot.slane %v478_v25, 4  ;;  %v419_v29 = vld [vmem:[%s4865_s23 + $0x40] sm:$0xf] }
  0x1c   : > { %270 = vrot.lane.b32.xlu1 %v247_v10, %s4809_s24  ;;  %268 = vrot.lane.b32.xlu0 %v4885_v5, %s4809_s24  ;;  %v427_v31 = vrot.slane %v419_v29, 4  ;;  %v393_v32 = vld [vmem:[%s4865_s23 + $0x40] sm:$0xf] }
  0x1d   : > { %v475_v33 = vld [vmem:[%s4865_s23] sm:$0xf] }
  0x1e   : > { %v483_v34 = vrot.slane %v475_v33, 4  ;;  %v449_v35 = vld [vmem:[%s4865_s23] sm:$0xf] }
  0x1f   : > { %v505_v37 = vld [vmem:[%s4865_s23] ss:$8 sm:$0xf] }
  0x20   : > { %264 = vrot.lane.b32.xlu1 %v244_v6, %s4809_s24  ;;  %256 = vrot.lane.b32.xlu0 %v240_v7, %s4809_s24 }
  0x24   : > { %311 = vrot.lane.b32.xlu1 %v4878_v3, %s4810_s25  ;;  %309 = vrot.lane.b32.xlu0 %v4869_v1, %s4810_s25 }
  0x28   : > { %317 = vrot.lane.b32.xlu1 %v4872_v2, %s4810_s25  ;;  %313 = vrot.lane.b32.xlu0 %v243_v0, %s4810_s25 }
  0x2c   : > { %321 = vrot.lane.b32.xlu1 %v247_v10, %s4810_s25  ;;  %319 = vrot.lane.b32.xlu0 %v4885_v5, %s4810_s25 }
  0x30   : > { %315 = vrot.lane.b32.xlu1 %v244_v6, %s4810_s25  ;;  %307 = vrot.lane.b32.xlu0 %v240_v7, %s4810_s25 }
  0x34   : > { %362 = vrot.lane.b32.xlu1 %v4878_v3, %s4811_s26  ;;  %360 = vrot.lane.b32.xlu0 %v4869_v1, %s4811_s26 }
  0x38   : > { %368 = vrot.lane.b32.xlu1 %v4872_v2, %s4811_s26  ;;  %364 = vrot.lane.b32.xlu0 %v243_v0, %s4811_s26 }
  0x3c   : > { %372 = vrot.lane.b32.xlu1 %v247_v10, %s4811_s26  ;;  %370 = vrot.lane.b32.xlu0 %v4885_v5, %s4811_s26 }
  0x40   : > { %366 = vrot.lane.b32.xlu1 %v244_v6, %s4811_s26  ;;  %358 = vrot.lane.b32.xlu0 %v240_v7, %s4811_s26 }
  0x44   : > { %405 = vrot.lane.b32.xlu1 %v395_v11, %s4812_s27  ;;  %403 = vrot.lane.b32.xlu0 %v394_v12, %s4812_s27 }
  0x48   : > { %433 = vrot.lane.b32.xlu1 %v428_v14, %s4813_s28  ;;  %407 = vrot.lane.b32.xlu0 %v396_v15, %s4812_s27 }
  0x4c   : > { %437 = vrot.lane.b32.xlu1 %v430_v18, %s4813_s28  ;;  %435 = vrot.lane.b32.xlu0 %v429_v19, %s4813_s28 }
  0x50   : > { %461 = vrot.lane.b32.xlu1 %v451_v20, %s4814_s29  ;;  %459 = vrot.lane.b32.xlu0 %v450_v21, %s4814_s29 }
  0x54   : > { %489 = vrot.lane.b32.xlu1 %v484_v23, %s4815_s30  ;;  %463 = vrot.lane.b32.xlu0 %v452_v24, %s4814_s29 }
  0x58   : > { %493 = vrot.lane.b32.xlu1 %v486_v27, %s4815_s30  ;;  %491 = vrot.lane.b32.xlu0 %v485_v28, %s4815_s30 }
  0x5c   : > { %431 = vrot.lane.b32.xlu1 %v427_v31, %s4813_s28  ;;  %401 = vrot.lane.b32.xlu0 %v393_v32, %s4812_s27 }
  0x60   : > { %487 = vrot.lane.b32.xlu1 %v483_v34, %s4815_s30  ;;  %457 = vrot.lane.b32.xlu0 %v449_v35, %s4814_s29 }
  0x64   : > { %507 = vrot.lane.b32.xlu0 %v505_v37, %s4817_s6  ;;  %4571 = vrot.lane.b32.xlu1 %v4570_v36, %s4809_s24 }
  0x68   : > { %4576 = vrot.lane.b32.xlu0 %v4575_v38, %s4809_s24  ;;  %4581 = vrot.lane.b32.xlu1 %v4889_v8, %s4809_s24 }
  0x6c   : > { %4591 = vrot.lane.b32.xlu0 %v4575_v38, %s4810_s25  ;;  %4586 = vrot.lane.b32.xlu1 %v4570_v36, %s4810_s25 }
  0x70   : > { %4596 = vrot.lane.b32.xlu1 %v4889_v8, %s4810_s25 }
  0x86   : > { %v263_v40 = vpop.permute.xlu1 %262  ;;  %v259_v41 = vpop.permute.xlu0 %258 }
  0x8a   : > { %v267_v42 = vpop.permute.xlu1 %266  ;;  %v261_v43 = vpop.permute.xlu0 %260 }
  0x8b   : > { %v4978_v44 = vsel %vm272_vm1, %v259_v41, %v261_v43  ;;  %v4981_v45 = vsel %vm272_vm1, %v261_v43, %v263_v40 }
  0x8c   : > { %v4985_v46 = vpack.i.bf16 %v4981_v45, %v4978_v44 }
  0x8e   : > { %v271_v47 = vpop.permute.xlu1 %270  ;;  %v269_v48 = vpop.permute.xlu0 %268  ;;  %4601 = vrot.lane.b32.xlu0 %v4985_v46, %s4809_s24 }
  0x8f   : > { %v4990_v49 = vsel %vm272_vm1, %v267_v42, %v269_v48  ;;  %v4993_v50 = vsel %vm272_vm1, %v269_v48, %v271_v47 }
  0x90   : > { %v4997_v51 = vpack.c.bf16 %v4993_v50, %v4981_v45  ;;  %v5001_v52 = vpack.i.bf16 %v4993_v50, %v4990_v49  ;;  %v5005_v53 = vpack.c.bf16 %v4990_v49, %v4978_v44 }
  0x92   : > { %v265_v56 = vpop.permute.xlu1 %264  ;;  %v257_v57 = vpop.permute.xlu0 %256  ;;  %4606 = vrot.lane.b32.xlu1 %v5001_v52, %s4809_s24  ;;  %4112 = vmatprep.subr.bf16.mxu1 %v5005_v53 }
  0x93   : > { %v276_v58 = vsel %vm272_vm1, %v265_v56, %v267_v42  ;;  %v273_v59 = vsel %vm272_vm1, %v257_v57, %v259_v41 }
  0x94   : > { %v5016_v60 = vpack.i.bf16 %v276_v58, %v273_v59  ;;  %v5018_v61 = vpack.c.bf16 %v276_v58, %v273_v59 }
  0x96   : > { %v312_v62 = vpop.permute.xlu1 %311  ;;  %v310_v63 = vpop.permute.xlu0 %309  ;;  %4611 = vrot.lane.b32.xlu0 %v5016_v60, %s4809_s24  ;;  %4114 = vmatpush1.bf16.msra.mxu1 %v5018_v61 }
  0x97   : > { %v5024_v0 = vsel %vm323_vm2, %v310_v63, %v312_v62 }
  0x9a   : > { %v318_v6 = vpop.permute.xlu1 %317  ;;  %v314_v7 = vpop.permute.xlu0 %313 }
  0x9b   : > { %v5027_v10 = vsel %vm323_vm2, %v312_v62, %v314_v7 }
  0x9c   : > { %v5031_v11 = vpack.i.bf16 %v5027_v10, %v5024_v0 }
  0x9e   : > { %v322_v12 = vpop.permute.xlu1 %321  ;;  %v320_v13 = vpop.permute.xlu0 %319  ;;  %4616 = vrot.lane.b32.xlu1 %v5031_v11, %s4809_s24 }
  0x9f   : > { %v5036_v14 = vsel %vm323_vm2, %v318_v6, %v320_v13  ;;  %v5039_v15 = vsel %vm323_vm2, %v320_v13, %v322_v12 }
  0xa0   : > { %v5043_v16 = vpack.c.bf16 %v5039_v15, %v5027_v10  ;;  %v5047_v17 = vpack.i.bf16 %v5039_v15, %v5036_v14  ;;  %v5051_v18 = vpack.c.bf16 %v5036_v14, %v5024_v0 }
  0xa2   : > { %v316_v21 = vpop.permute.xlu1 %315  ;;  %v308_v22 = vpop.permute.xlu0 %307  ;;  %4621 = vrot.lane.b32.xlu0 %v5047_v17, %s4809_s24  ;;  %4116 = vmatprep.subr.bf16.mxu1 %v5051_v18 }
  0xa3   : > { %v327_v23 = vsel %vm323_vm2, %v316_v21, %v318_v6  ;;  %v324_v24 = vsel %vm323_vm2, %v308_v22, %v310_v63 }
  0xa4   : > { %v5062_v25 = vpack.i.bf16 %v327_v23, %v324_v24  ;;  %v5064_v26 = vpack.c.bf16 %v327_v23, %v324_v24 }
  0xa6   : > { %v363_v27 = vpop.permute.xlu1 %362  ;;  %v361_v28 = vpop.permute.xlu0 %360  ;;  %4626 = vrot.lane.b32.xlu1 %v5062_v25, %s4809_s24  ;;  %4118 = vmatpush1.bf16.msra.mxu1 %v5064_v26 }
  0xa7   : > { %v5070_v29 = vsel %vm374_vm3, %v361_v28, %v363_v27 }
  0xaa   : > { %v369_v31 = vpop.permute.xlu1 %368  ;;  %v365_v32 = vpop.permute.xlu0 %364 }
  0xab   : > { %v5073_v33 = vsel %vm374_vm3, %v363_v27, %v365_v32 }
  0xac   : > { %v5077_v34 = vpack.i.bf16 %v5073_v33, %v5070_v29 }
  0xae   : > { %v373_v35 = vpop.permute.xlu1 %372  ;;  %v371_v36 = vpop.permute.xlu0 %370  ;;  %4631 = vrot.lane.b32.xlu0 %v5077_v34, %s4809_s24 }
  0xaf   : > { %v5082_v37 = vsel %vm374_vm3, %v369_v31, %v371_v36  ;;  %v5085_v38 = vsel %vm374_vm3, %v371_v36, %v373_v35 }
  0xb0   : > { %v5089_v40 = vpack.i.bf16 %v5085_v38, %v5082_v37  ;;  %v5093_v41 = vpack.c.bf16 %v5082_v37, %v5070_v29 }
  0xb2   : > { %v367_v47 = vpop.permute.xlu1 %366  ;;  %v359_v48 = vpop.permute.xlu0 %358  ;;  %4636 = vrot.lane.b32.xlu1 %v5089_v40, %s4809_s24  ;;  %4120 = vmatprep.subr.bf16.mxu1 %v5093_v41 }
  0xb3   : > { %v378_v56 = vsel %vm374_vm3, %v367_v47, %v369_v31  ;;  %v375_v57 = vsel %vm374_vm3, %v359_v48, %v361_v28 }
  0xb4   : > { %v5104_v58 = vpack.i.bf16 %v378_v56, %v375_v57  ;;  %v5106_v59 = vpack.c.bf16 %v378_v56, %v375_v57 }
  0xb6   : > { %v406_v62 = vpop.permute.xlu1 %405  ;;  %v404_v63 = vpop.permute.xlu0 %403  ;;  %4641 = vrot.lane.b32.xlu0 %v5104_v58, %s4809_s24  ;;  %4651 = vrot.lane.b32.xlu1 %v5001_v52, %s4810_s25 }
  0xb7   : > { %v411_v6 = vsel %vm409_vm4, %v404_v63, %v406_v62  ;;  %4122 = vmatpush1.bf16.msra.mxu1 %v5106_v59 }
  0xb8   : > { %417 = vst [vmem:[#allocation2 + $0xc8] sm:$0xf] %v411_v6 }
  0xba   : > { %v434_v7 = vpop.permute.xlu1 %433  ;;  %v408_v12 = vpop.permute.xlu0 %407  ;;  %4646 = vrot.lane.b32.xlu0 %v4985_v46, %s4810_s25 }
  0xbb   : > { %v412_v13 = vsel %vm409_vm4, %v406_v62, %v408_v12 }
  0xbc   : > { %418 = vst [vmem:[#allocation2 + $0xd0] sm:$0xf] %v412_v13 }
  0xbe   : > { %v438_v21 = vpop.permute.xlu1 %437  ;;  %v436_v22 = vpop.permute.xlu0 %435  ;;  %4656 = vrot.lane.b32.xlu0 %v5016_v60, %s4810_s25 }
  0xbf   : > { %v441_v52 = vsel %vm439_vm5, %v434_v7, %v436_v22  ;;  %v442_v23 = vsel %vm439_vm5, %v436_v22, %v438_v21 }
  0xc0   : > { %447 = vst [vmem:[#allocation2 + $0xc8] sm:$0xf0] %v441_v52  ;;  %448 = vst [vmem:[#allocation2 + $0xd0] sm:$0xf0] %v442_v23 }
  0xc2   : > { %v462_v24 = vpop.permute.xlu1 %461  ;;  %v460_v27 = vpop.permute.xlu0 %459 }
  0xc3   : > { %v467_v46 = vsel %vm465_vm6, %v460_v27, %v462_v24 }
  0xc4   : > { %473 = vst [vmem:[#allocation2 + $0xe0] sm:$0xf] %v467_v46  ;;  %v7098_v46 = vlaneseq }
  0xc6   : > { %v490_v28 = vpop.permute.xlu1 %489  ;;  %v464_v31 = vpop.permute.xlu0 %463  ;;  %vm515_vm9 = vcmp.lt.s32.totalorder %v7098_v46, 384 }
  0xc7   : > { %v468_v32 = vsel %vm465_vm6, %v462_v24, %v464_v31  ;;  %v5123_v35 = vld [vmem:[#allocation2 + $0xc8] sm:$0xff]  ;;  %v5125_v36 = vld [vmem:[#allocation2 + $0xd0] sm:$0xff] }
  0xc8   : > { %474 = vst [vmem:[#allocation2 + $0xe8] sm:$0xf] %v468_v32  ;;  %v5129_v47 = vpack.i.bf16 %v5125_v36, %v5123_v35 }
  0xca   : > { %v494_v48 = vpop.permute.xlu1 %493  ;;  %v492_v56 = vpop.permute.xlu0 %491  ;;  %4661 = vrot.lane.b32.xlu1 %v5129_v47, %s4809_s24 }
  0xcb   : > { %v497_v57 = vsel %vm495_vm7, %v490_v28, %v492_v56  ;;  %v498_v62 = vsel %vm495_vm7, %v492_v56, %v494_v48 }
  0xcc   : > { %503 = vst [vmem:[#allocation2 + $0xe0] sm:$0xf0] %v497_v57  ;;  %504 = vst [vmem:[#allocation2 + $0xe8] sm:$0xf0] %v498_v62 }
  0xce   : > { %v432_v6 = vpop.permute.xlu1 %431  ;;  %v402_v12 = vpop.permute.xlu0 %401 }
  0xcf   : > { %v440_v13 = vsel %vm439_vm5, %v432_v6, %v434_v7  ;;  %v410_v21 = vsel %vm409_vm4, %v402_v12, %v404_v63 }
  0xd0   : > { %446 = vst [vmem:[#allocation2 + $0xc0] sm:$0xf0] %v440_v13  ;;  %416 = vst [vmem:[#allocation2 + $0xc0] sm:$0xf] %v410_v21 }
  0xd2   : > { %v488_v22 = vpop.permute.xlu1 %487  ;;  %v458_v52 = vpop.permute.xlu0 %457 }
  0xd3   : > { %v496_v23 = vsel %vm495_vm7, %v488_v22, %v490_v28  ;;  %v466_v24 = vsel %vm465_vm6, %v458_v52, %v460_v27  ;;  %v5139_v31 = vld [vmem:[#allocation2 + $0xe0] sm:$0xff]  ;;  %v5141_v32 = vld [vmem:[#allocation2 + $0xe8] sm:$0xff]  ;;  %vm3245_vm6 = vcmask 261120  }
  0xd4   : > { %502 = vst [vmem:[#allocation2 + $0xd8] sm:$0xf0] %v496_v23  ;;  %472 = vst [vmem:[#allocation2 + $0xd8] sm:$0xf] %v466_v24  ;;  %v5145_v7 = vpack.i.bf16 %v5141_v32, %v5139_v31  ;;  %v5149_v63 = vpack.c.bf16 %v5139_v31, %v5123_v35 }
  0xd6   : > { %v508_v27 = vpop.permute.xlu0 %507  ;;  %4666 = vrot.lane.b32.xlu0 %v5145_v7, %s4809_s24  ;;  %4124 = vmatprep.subr.bf16.mxu1 %v5149_v63  ;;  %v5156_v48 = vpop.permute.xlu1 %4571 }
  0xd7   : > { %v509_v56 = vrot.slane %v508_v27, 1  ;;  %v7100_v62 = vunpack.i.h.bf16 %v5156_v48  ;;  %v556_v13 = vld [vmem:[#allocation2 + $0xc0] sm:$0xff] }
  0xd9   : > { %v511_v57 = vsel %vm510_vm8, %v508_v27, %v509_v56 }
  0xda   : > { %518 = vst.msk [vmem:[#allocation2 + $0xf0] ss:$8 sm:$0x7] %vm515_vm9, %v511_v57  ;;  %v5160_v6 = vpop.permute.xlu0 %4576  ;;  %v5162_v12 = vpop.permute.xlu1 %4581 }
  0xdb   : > { %v559_v21 = vld [vmem:[#allocation2 + $0xd8] sm:$0xff]  ;;  %v7099_v22 = vunpack.i.h.bf16 %v5160_v6 }
  0xdc   : > { %v5165_v52 = vpack.i.bf16 %v559_v21, %v556_v13  ;;  %v5167_v23 = vpack.c.bf16 %v559_v21, %v556_v13  ;;  %v5182_v13 = vpack.c.bf16 %v4885_v5, %v4878_v3 }
  0xdd   : > { %v5173_v24 = vpack.c.bf16 %v7099_v22, %v7100_v62 }
  0xde   : > { %4671 = vrot.lane.b32.xlu1 %v5165_v52, %s4809_s24  ;;  %4126 = vmatpush1.bf16.msra.mxu1 %v5167_v23  ;;  %v4592_v27 = vpop.permute.xlu0 %4591  ;;  %v4587_v56 = vpop.permute.xlu1 %4586 }
  0xdf   : > { %7150 = vst [vmem:[#allocation3_spill] sm:$0xff] %v5173_v24  ;;  %v4594_v57 = vunpack.i.h.bf16 %v4592_v27  ;;  %v4593_v46 = vunpack.i.l.bf16 %v4592_v27  ;;  %v4589_v28 = vunpack.i.h.bf16 %v4587_v56  ;;  %v4588_v43 = vunpack.i.l.bf16 %v4587_v56  ;;  %4168 = vmatprep.subr.bf16.mxu0 %v5173_v24 }
  0xe0   : > { %4170 = vmatpush3.bf16.msra.mxu0 %v5173_v24  ;;  %v7153_v24 = vunpack.i.h.bf16 %v5160_v6 }
  0xe1   : > { %v5184_v21 = vld [vmem:[#allocation2 + $0xf8] sm:$0xff]  ;;  %v5186_v20 = vld [vmem:[#allocation2 + $0x100] sm:$0xff]  ;;  %v5188_v55 = vld [vmem:[#allocation2 + $0xf0] sm:$0xff]  ;;  %v5190_v42 = vpack.c.bf16 %v4594_v57, %v4589_v28  ;;  %v1249_v27 = vsel %vm323_vm2, %v4588_v43, %v4589_v28  ;;  %v1251_v56 = vsel %vm323_vm2, %v4593_v46, %v4594_v57 }
  0xe2   : > { %875 = vrot.lane.b32.xlu0 %v5184_v21, %s4809_s24  ;;  %877 = vrot.lane.b32.xlu1 %v5186_v20, %s4809_s24  ;;  %v4597_v19 = vpop.permute.xlu1 %4596  ;;  %v5198_v54 = vpack.c.bf16 %v1251_v56, %v1249_v27  ;;  %v4583_v56 = vunpack.i.l.bf16 %v5162_v12 }
  0xe3   : > { %604 = vmatprep.subr.mxu1 %v5184_v21  ;;  %v4599_v22 = vunpack.i.h.bf16 %v4597_v19  ;;  %v4598_v62 = vunpack.i.l.bf16 %v4597_v19  ;;  %v5213_v19 = vld [vmem:[%s7093_s1 + $0x8] sm:$0xff] }
  0xe4   : > { %605 = vmatpush1.msra.mxu1 %v5188_v55 }
  0xe5   : > { %4128 = vmatprep.subr.bf16.mxu1 %v5182_v13  ;;  %3541 = vmatmul.mubr.msk.f32.vlgmr.msra.gmra.mrb[0].mxu1 %vm565_vm0, %v4966_v39  ;;  %v1250_v28 = vsel %vm323_vm2, %v4599_v22, %v4593_v46  ;;  %v1248_v57 = vsel %vm323_vm2, %v4598_v62, %v4588_v43  ;;  %v5229_v43 = vld [vmem:[%s7093_s1 + $0x10] sm:$0xff]  ;;  %v5255_v46 = vpack.c.bf16 %v5141_v32, %v5125_v36  ;;  %v4573_v62 = vunpack.i.l.bf16 %v5156_v48 }
  0xe6   : > { %4130 = vmatpush3.bf16.msra.mxu1 %v5182_v13  ;;  %873 = vrot.lane.b32.xlu0 %v5188_v55, %s4809_s24  ;;  %v5215_v27 = vpack.c.bf16 %v1250_v28, %v1248_v57  ;;  %v4584_v22 = vunpack.i.h.bf16 %v5162_v12  ;;  %v7152_v28 = vunpack.i.h.bf16 %v5156_v48  ;;  %s224_s24 = scalar_lea.vmem %s7097_s5, %s4551_s20 }
  0xe7   : > { %4676 = vrot.lane.b32.xlu1 %v5031_v11, %s4810_s25  ;;  %4132 = vmatprep.subr.bf16.mxu1 %v4997_v51  ;;  %v5237_v11 = vpack.c.bf16 %v5085_v38, %v5073_v33 }
  0xe8   : > { %654 = vmatprep.mubr.f32.mxu1 %v7113_v30  ;;  %v880_v57 = vsel %vm272_vm1, %v4573_v62, %v7152_v28 }
  0xe9   : > { %3542 = vmatmul.mubr.msk.f32.gmra.mrb[2].mxu1 %vm565_vm0, %v5213_v19  ;;  %7151 = vst [vmem:[#allocation4_spill] sm:$0xff] %v5237_v11 }
  0xea   : > { %4134 = vmatpush3.bf16.msra.mxu1 %v4997_v51  ;;  %4681 = vrot.lane.b32.xlu0 %v5047_v17, %s4810_s25  ;;  %v5247_v17 = vld [vmem:[%s7093_s1 + $0x18] sm:$0xff] }
  0xeb   : > { %4686 = vrot.lane.b32.xlu1 %v5062_v25, %s4810_s25  ;;  %4136 = vmatprep.subr.bf16.mxu1 %v5043_v16 }
  0xec   : > { %660 = vmatprep.mubr.f32.mxu1 %v7113_v30 }
  0xed   : > { %3543 = vmatmul.mubr.msk.f32.gmra.mrb[4].mxu1 %vm565_vm0, %v5229_v43 }
  0xee   : > { %4138 = vmatpush3.bf16.msra.mxu1 %v5043_v16  ;;  %4691 = vrot.lane.b32.xlu0 %v5077_v34, %s4810_s25  ;;  %v4578_v34 = vunpack.i.l.bf16 %v5160_v6  ;;  %v879_v6 = vsel %vm272_vm1, %v4583_v56, %v4573_v62  ;;  %v4740_v56 = vpack.i.bf16 %v5141_v32, %v5125_v36 }
  0xef   : > { %4696 = vrot.lane.b32.xlu1 %v5089_v40, %s4810_s25  ;;  %4140 = vmatprep.subr.bf16.mxu1 %v5237_v11  ;;  %v5267_v40 = vld [vmem:[%s7093_s1 + $0x20] sm:$0xff] }
  0xf0   : > { %666 = vmatprep.mubr.f32.mxu1 %v7113_v30  ;;  %v881_v48 = vsel %vm272_vm1, %v4584_v22, %v4578_v34 }
  0xf1   : > { %3544 = vmatmul.mubr.msk.f32.gmra.mrb[6].mxu1 %vm565_vm0, %v5247_v17 }
  0xf2   : > { %4142 = vmatpush3.bf16.msra.mxu1 %v5237_v11  ;;  %4701 = vrot.lane.b32.xlu0 %v5104_v58, %s4810_s25  ;;  %v882_v11 = vsel %vm272_vm1, %v4578_v34, %v7153_v24  ;;  %v4720_v24 = vpack.i.bf16 %v4885_v5, %v4878_v3  ;;  %v7156_v3 = vpack.i.bf16 %v4993_v50, %v4981_v45 }
  0xf3   : > { %4706 = vrot.lane.b32.xlu1 %v5129_v47, %s4810_s25  ;;  %4144 = vmatprep.subr.bf16.mxu1 %v5255_v46  ;;  %v5289_v47 = vld [vmem:[%s7093_s1 + $0x28] sm:$0xff]  ;;  %v5297_v12 = vpack.c.bf16 %v882_v11, %v880_v57  ;;  %v7157_v5 = vpack.i.bf16 %v5039_v15, %v5027_v10  ;;  %v7158_v45 = vpack.i.bf16 %v5085_v38, %v5073_v33 }
  0xf4   : > { %672 = vmatprep.mubr.f32.mxu1 %v7113_v30  ;;  %v4745_v50 = vpack.i.bf16 %v4872_v2, %v4869_v1  ;;  %v7162_v38 = vpack.i.bf16 %v4990_v49, %v4978_v44  ;;  %v7164_v49 = vpack.i.bf16 %v5082_v37, %v5070_v29 }
  0xf5   : > { %3545 = vmatmul.mubr.msk.f32.gmra.mrb[8].mxu1 %vm565_vm0, %v5267_v40  ;;  %7154 = vst [vmem:[#allocation5_spill] sm:$0xff] %v5297_v12 }
  0xf6   : > { %4146 = vmatpush3.bf16.msra.mxu1 %v5255_v46  ;;  %4711 = vrot.lane.b32.xlu0 %v5145_v7, %s4810_s25  ;;  %v5304_v7 = vpack.c.bf16 %v881_v48, %v879_v6 }
  0xf7   : > { %4716 = vrot.lane.b32.xlu1 %v5165_v52, %s4810_s25  ;;  %3848 = vmatprep.subr.mxu1 %v5186_v20 }
  0xf8   : > { %678 = vmatprep.mubr.f32.mxu1 %v7113_v30  ;;  %7155 = vst [vmem:[#allocation6_spill] sm:$0xff] %v5304_v7 }
  0xf9   : > { %3546 = vmatmul.mubr.msk.f32.gmra.mrb[10].mxu1 %vm565_vm0, %v5289_v47 }
  0xfa   : > { %3849 = vmatpush3.msra.mxu1 %v5186_v20  ;;  %1244 = vrot.lane.b32.xlu0 %v5184_v21, %s4810_s25 }
  0xfb   : > { %1246 = vrot.lane.b32.xlu1 %v5186_v20, %s4810_s25  ;;  %3850 = vmatprep.mubr.msk.f32.mxu1 %vm565_vm0, %v4966_v39 }
  0xfc   : > { %4148 = vmatprep.subr.bf16.mxu1 %v5297_v12 }
  0xfd   : > { %3851 = vmatmul.mubr.msk.f32.vlgmr.msra.gmra.mrb[12].mxu1 %vm565_vm0, %v5213_v19 }
  0xfe   : > { %1242 = vrot.lane.b32.xlu0 %v5188_v55, %s4810_s25  ;;  %4150 = vmatpush1.bf16.msra.mxu1 %v5304_v7 }
  0xff   : > { %4721 = vrot.lane.b32.xlu1 %v4720_v24, %s4811_s26  ;;  %3853 = vmatprep.mubr.msk.f32.mxu1 %vm565_vm0, %v5229_v43 }
 0x100   : > { %v4602_v11 = vpop.permute.xlu0 %4601 }
 0x101   : > { %3854 = vmatmul.mubr.msk.f32.gmra.mrb[14].mxu1 %vm565_vm0, %v5247_v17  ;;  %v4604_v62 = vunpack.i.h.bf16 %v4602_v11  ;;  %v4603_v34 = vunpack.i.l.bf16 %v4602_v11 }
 0x102   : > { %4726 = vrot.lane.b32.xlu0 %v7156_v3, %s4811_s26  ;;  %3856 = vmatprep.mubr.msk.f32.mxu1 %vm565_vm0, %v5267_v40 }
 0x103   : > { %4731 = vrot.lane.b32.xlu1 %v7157_v5, %s4811_s26  ;;  %v884_v15 = vsel %vm272_vm1, %v4603_v34, %v4604_v62 }
 0x104   : > { %v4607_v22 = vpop.permute.xlu1 %4606 }
 0x105   : > { %v4609_v28 = vunpack.i.h.bf16 %v4607_v22  ;;  %v4608_v57 = vunpack.i.l.bf16 %v4607_v22  ;;  %3857 = vmatmul.mubr.msk.f32.gmra.mrb[16].mxu1 %vm565_vm0, %v5289_v47 }
 0x106   : > { %4736 = vrot.lane.b32.xlu0 %v7158_v45, %s4811_s26  ;;  %998 = vmatprep.mubr.f32.mxu1 %v7113_v30 }
 0x107   : > { %4741 = vrot.lane.b32.xlu1 %v4740_v56, %s4811_s26  ;;  %v5345_v10 = vpack.c.bf16 %v4609_v28, %v4604_v62  ;;  %v886_v36 = vsel %vm272_vm1, %v4608_v57, %v4609_v28 }
 0x108   : > { %v4612_v32 = vpop.permute.xlu0 %4611  ;;  %v5349_v48 = vpack.c.bf16 %v886_v36, %v884_v15 }
 0x109   : > { %7159 = vst [vmem:[#allocation7_spill] sm:$0xff] %v5345_v10  ;;  %v4614_v6 = vunpack.i.h.bf16 %v4612_v32  ;;  %v4613_v24 = vunpack.i.l.bf16 %v4612_v32  ;;  %4172 = vmatprep.subr.bf16.mxu0 %v5345_v10 }
 0x10a   : > { %7160 = vst [vmem:[#allocation8_spill] sm:$0xff] %v5349_v48  ;;  %4746 = vrot.lane.b32.xlu0 %v4745_v50, %s4811_s26  ;;  %4152 = vmatprep.subr.bf16.mxu1 %v5349_v48 }
 0x10b   : > { %4751 = vrot.lane.b32.xlu1 %v4889_v8, %s4811_s26  ;;  %v883_v1 = vsel %vm272_vm1, %v4613_v24, %v4603_v34  ;;  %v885_v2 = vsel %vm272_vm1, %v4614_v6, %v4608_v57  ;;  %4174 = vmatpush3.bf16.msra.mxu0 %v5345_v10  ;;  %v7163_v8 = vpack.i.bf16 %v5036_v14, %v5024_v0 }
 0x10c   : > { %v5359_v33 = vpack.c.bf16 %v885_v2, %v883_v1 }
 0x10e   : > { %7161 = vst [vmem:[#allocation9_spill] sm:$0xff] %v5359_v33  ;;  %4756 = vrot.lane.b32.xlu0 %v7162_v38, %s4811_s26  ;;  %4154 = vmatpush1.bf16.msra.mxu1 %v5359_v33 }
 0x10f   : > { %1615 = vrot.lane.b32.xlu1 %v5186_v20, %s4811_s26 }
 0x110   : > { %v4617_v11 = vpop.permute.xlu1 %4616 }
 0x111   : > { %v4619_v3 = vunpack.i.h.bf16 %v4617_v11  ;;  %v4618_v5 = vunpack.i.l.bf16 %v4617_v11 }
 0x112   : > { %4761 = vrot.lane.b32.xlu0 %v5016_v60, %s4811_s26 }
 0x113   : > { %4766 = vrot.lane.b32.xlu1 %v7163_v8, %s4811_s26  ;;  %v888_v60 = vsel %vm272_vm1, %v4618_v5, %v4619_v3 }
 0x114   : > { %v4622_v62 = vpop.permute.xlu0 %4621 }
 0x115   : > { %v4624_v34 = vunpack.i.h.bf16 %v4622_v62  ;;  %v4623_v44 = vunpack.i.l.bf16 %v4622_v62 }
 0x116   : > { %4771 = vrot.lane.b32.xlu0 %v5062_v25, %s4811_s26  ;;  %v7167_v25 = vpack.i.bf16 %v5139_v31, %v5123_v35 }
 0x117   : > { %4776 = vrot.lane.b32.xlu1 %v7164_v49, %s4811_s26  ;;  %v5380_v22 = vpack.c.bf16 %v4624_v34, %v4619_v3  ;;  %v890_v0 = vsel %vm272_vm1, %v4623_v44, %v4624_v34 }
 0x118   : > { %v4627_v14 = vpop.permute.xlu1 %4626  ;;  %v5384_v56 = vpack.c.bf16 %v890_v0, %v888_v60 }
 0x119   : > { %7165 = vst [vmem:[#allocation10_spill] sm:$0xff] %v5380_v22  ;;  %v4629_v28 = vunpack.i.h.bf16 %v4627_v14  ;;  %v4628_v57 = vunpack.i.l.bf16 %v4627_v14  ;;  %4176 = vmatprep.subr.bf16.mxu0 %v5380_v22 }
 0x11a   : > { %7166 = vst [vmem:[#allocation11_spill] sm:$0xff] %v5384_v56  ;;  %4781 = vrot.lane.b32.xlu0 %v5104_v58, %s4811_s26  ;;  %4156 = vmatprep.subr.bf16.mxu1 %v5384_v56 }
 0x11b   : > { %4786 = vrot.lane.b32.xlu1 %v7167_v25, %s4811_s26  ;;  %v889_v29 = vsel %vm272_vm1, %v4629_v28, %v4623_v44  ;;  %v887_v37 = vsel %vm272_vm1, %v4628_v57, %v4618_v5  ;;  %4178 = vmatpush3.bf16.msra.mxu0 %v5380_v22 }
 0x11c   : > { %v5397_v45 = vpack.c.bf16 %v889_v29, %v887_v37 }
 0x11e   : > { %7168 = vst [vmem:[#allocation12_spill] sm:$0xff] %v5397_v45  ;;  %4791 = vrot.lane.b32.xlu0 %v5165_v52, %s4811_s26  ;;  %4158 = vmatpush1.bf16.msra.mxu1 %v5397_v45 }
 0x11f   : > { %1613 = vrot.lane.b32.xlu1 %v5184_v21, %s4811_s26 }
 0x120   : > { %v4632_v58 = vpop.permute.xlu0 %4631 }
 0x121   : > { %v4634_v35 = vunpack.i.h.bf16 %v4632_v58  ;;  %v4633_v31 = vunpack.i.l.bf16 %v4632_v58 }
 0x122   : > { %1611 = vrot.lane.b32.xlu0 %v5188_v55, %s4811_s26 }
 0x123   : > { %v892_v6 = vsel %vm272_vm1, %v4633_v31, %v4634_v35 }
 0x124   : > { %v4637_v50 = vpop.permute.xlu1 %4636 }
 0x125   : > { %v4639_v15 = vunpack.i.h.bf16 %v4637_v50  ;;  %v4638_v36 = vunpack.i.l.bf16 %v4637_v50 }
 0x127   : > { %v5406_v32 = vpack.c.bf16 %v4639_v15, %v4634_v35  ;;  %v894_v52 = vsel %vm272_vm1, %v4638_v36, %v4639_v15 }
 0x128   : > { %v4642_v24 = vpop.permute.xlu0 %4641  ;;  %v5410_v1 = vpack.c.bf16 %v894_v52, %v892_v6  ;;  %v5422_v62 = vpop.permute.xlu1 %4651 }
 0x129   : > { %7169 = vst [vmem:[#allocation13_spill] sm:$0xff] %v5406_v32  ;;  %v4644_v2 = vunpack.i.h.bf16 %v4642_v24  ;;  %v4643_v38 = vunpack.i.l.bf16 %v4642_v24  ;;  %4180 = vmatprep.subr.bf16.mxu0 %v5406_v32 }
 0x12a   : > { %7170 = vst [vmem:[#allocation14_spill] sm:$0xff] %v5410_v1  ;;  %4160 = vmatprep.subr.bf16.mxu1 %v5410_v1  ;;  %4182 = vmatpush3.bf16.msra.mxu0 %v5406_v32 }
 0x12b   : > { %v891_v11 = vsel %vm272_vm1, %v4643_v38, %v4633_v31  ;;  %v893_v8 = vsel %vm272_vm1, %v4644_v2, %v4638_v36 }
 0x12c   : > { %v5417_v3 = vpack.c.bf16 %v893_v8, %v891_v11  ;;  %v5420_v5 = vpop.permute.xlu0 %4646  ;;  %v7105_v11 = vunpack.i.h.bf16 %v5422_v62  ;;  %v4653_v8 = vunpack.i.l.bf16 %v5422_v62 }
 0x12d   : > { %v7107_v24 = vunpack.i.h.bf16 %v5420_v5  ;;  %v4648_v2 = vunpack.i.l.bf16 %v5420_v5 }
 0x12e   : > { %7171 = vst [vmem:[#allocation15_spill] sm:$0xff] %v5417_v3  ;;  %4162 = vmatpush1.bf16.msra.mxu1 %v5417_v3 }
 0x130   : > { %v4657_v34 = vpop.permute.xlu0 %4656 }
 0x13c   : > { %v4662_v44 = vpop.permute.xlu1 %4661 }
 0x13d   : > { %v4664_v49 = vunpack.i.h.bf16 %v4662_v44  ;;  %v4663_v60 = vunpack.i.l.bf16 %v4662_v44  ;;  %v4659_v44 = vunpack.i.h.bf16 %v4657_v34 }
 0x13f   : > { %v896_v25 = vsel %vm272_vm1, %v4663_v60, %v4664_v49 }
 0x148   : > { %v4667_v0 = vpop.permute.xlu0 %4666 }
 0x149   : > { %v4669_v14 = vunpack.i.h.bf16 %v4667_v0  ;;  %v4668_v28 = vunpack.i.l.bf16 %v4667_v0 }
 0x14b   : > { %v5424_v57 = vpack.c.bf16 %v4669_v14, %v4664_v49  ;;  %v898_v29 = vsel %vm272_vm1, %v4668_v28, %v4669_v14  ;;  %v4658_v49 = vunpack.i.l.bf16 %v4657_v34  ;;  %v1255_v34 = vsel %vm323_vm2, %v4653_v8, %v7105_v11 }
 0x14c   : > { %v5428_v37 = vpack.c.bf16 %v898_v29, %v896_v25 }
 0x14d   : > { %7172 = vst [vmem:[#allocation16_spill] sm:$0xff] %v5424_v57  ;;  %4184 = vmatprep.subr.bf16.mxu0 %v5424_v57 }
 0x14e   : > { %7173 = vst [vmem:[#allocation17_spill] sm:$0xff] %v5428_v37  ;;  %4164 = vmatprep.subr.bf16.mxu1 %v5428_v37  ;;  %4186 = vmatpush3.bf16.msra.mxu0 %v5424_v57  ;;  %v7178_v37 = vmov 0.0  }
 0x150   : > { %v4672_v58 = vpop.permute.xlu1 %4671 }
 0x151   : > { %v4674_v35 = vunpack.i.h.bf16 %v4672_v58  ;;  %v4673_v31 = vunpack.i.l.bf16 %v4672_v58  ;;  %v1252_v58 = vsel %vm323_vm2, %v4658_v49, %v4648_v2 }
 0x153   : > { %v897_v50 = vsel %vm272_vm1, %v4674_v35, %v4668_v28  ;;  %v895_v15 = vsel %vm272_vm1, %v4673_v31, %v4663_v60  ;;  %v1253_v28 = vsel %vm323_vm2, %v4648_v2, %v7107_v24  ;;  %v1254_v35 = vsel %vm323_vm2, %v4659_v44, %v4653_v8 }
 0x154   : > { %v5435_v36 = vpack.c.bf16 %v897_v50, %v895_v15  ;;  %v876_v6 = vpop.permute.xlu0 %875  ;;  %v5437_v52 = vpop.permute.xlu1 %877  ;;  %v5478_v50 = vpack.c.bf16 %v1255_v34, %v1253_v28  ;;  %v5487_v44 = vpack.c.bf16 %v1254_v35, %v1252_v58 }
 0x155   : > { %7175 = vst [vmem:[#allocation19_spill] sm:$0xff] %v5437_v52  ;;  %3879 = vmatprep.subr.mxu0 %v5437_v52  ;;  %v5444_v38 = vsel %vm272_vm1, %v876_v6, %v5437_v52 }
 0x156   : > { %7174 = vst [vmem:[#allocation18_spill] sm:$0xff] %v5435_v36  ;;  %7176 = vst [vmem:[#allocation20_spill] sm:$0xff] %v5444_v38  ;;  %4166 = vmatpush1.bf16.msra.mxu1 %v5435_v36  ;;  %3880 = vmatpush3.msra.mxu0 %v5437_v52 }
 0x157   : > { %954 = vmatprep.subr.mxu1 %v5444_v38  ;;  %3882 = vmatmul.mubr.msk.f32.vlgmr.msra.gmra.mrb[0].mxu0 %vm565_vm0, %v5213_v19 }
 0x158   : > { %v874_v60 = vpop.permute.xlu0 %873  ;;  %3884 = vmatprep.mubr.msk.f32.mxu0 %vm565_vm0, %v5229_v43 }
 0x159   : > { %v5456_v0 = vsel %vm272_vm1, %v874_v60, %v876_v6  ;;  %v5458_v14 = vpop.permute.xlu1 %4676 }
 0x15a   : > { %7177 = vst [vmem:[#allocation21_spill] sm:$0xff] %v5456_v0  ;;  %955 = vmatpush1.msra.mxu1 %v5456_v0  ;;  %v7106_v25 = vunpack.i.h.bf16 %v5458_v14  ;;  %v4678_v29 = vunpack.i.l.bf16 %v5458_v14 }
 0x15b   : > { %3553 = vmatmul.mubr.msk.f32.vlgmr.msra.gmra.mrb[18].mxu1 %vm565_vm0, %v4966_v39  ;;  %3885 = vmatmul.mubr.msk.f32.gmra.mrb[2].mxu0 %vm565_vm0, %v5247_v17 }
 0x15c   : > { %4188 = vmatprep.subr.bf16.mxu1 %v5198_v54  ;;  %v5476_v31 = vpop.permute.xlu0 %4681  ;;  %1004 = vmatprep.mubr.f32.mxu1 %v7113_v30  ;;  %v1257_v49 = vsel %vm323_vm2, %v4678_v29, %v7106_v25 }
 0x15d   : > { %v7108_v15 = vunpack.i.h.bf16 %v5476_v31  ;;  %v4683_v6 = vunpack.i.l.bf16 %v5476_v31  ;;  %v4687_v60 = vpop.permute.xlu1 %4686  ;;  %4190 = vmatpush1.bf16.msra.mxu1 %v5215_v27  ;;  %3887 = vmatprep.mubr.msk.f32.mxu0 %vm565_vm0, %v5267_v40 }
 0x15e   : > { %v4689_v2 = vunpack.i.h.bf16 %v4687_v60  ;;  %v4688_v8 = vunpack.i.l.bf16 %v4687_v60  ;;  %4192 = vmatprep.subr.bf16.mxu1 %v5478_v50 }
 0x15f   : > { %3554 = vmatmul.mubr.msk.f32.gmra.mrb[20].mxu1 %vm565_vm0, %v5213_v19  ;;  %3888 = vmatmul.mubr.msk.f32.gmra.mrb[4].mxu0 %vm565_vm0, %v5289_v47  ;;  %v1259_v28 = vsel %vm323_vm2, %v4683_v6, %v7108_v15 }
 0x160   : > { %v1258_v34 = vsel %vm323_vm2, %v4689_v2, %v4683_v6  ;;  %v1256_v60 = vsel %vm323_vm2, %v4688_v8, %v4678_v29  ;;  %v5501_v58 = vpop.permute.xlu0 %4691  ;;  %1010 = vmatprep.mubr.f32.mxu1 %v7113_v30  ;;  %v5504_v35 = vpack.c.bf16 %v1259_v28, %v1257_v49  ;;  %3943 = vmatprep.mubr.msk.f32.mxu0 %vm565_vm0, %v4966_v39 }
 0x161   : > { %v7112_v11 = vunpack.i.h.bf16 %v5501_v58  ;;  %v4693_v25 = vunpack.i.l.bf16 %v5501_v58  ;;  %v5510_v24 = vpop.permute.xlu1 %4696  ;;  %4194 = vmatpush1.bf16.msra.mxu1 %v5487_v44  ;;  %v5516_v2 = vpack.c.bf16 %v1258_v34, %v1256_v60 }
 0x162   : > { %v7115_v6 = vunpack.i.h.bf16 %v5510_v24  ;;  %v4698_v29 = vunpack.i.l.bf16 %v5510_v24  ;;  %4196 = vmatprep.subr.bf16.mxu1 %v5504_v35 }
 0x163   : > { %3555 = vmatmul.mubr.msk.f32.gmra.mrb[22].mxu1 %vm565_vm0, %v5229_v43  ;;  %v1261_v8 = vsel %vm323_vm2, %v4693_v25, %v7112_v11 }
 0x164   : > { %v4702_v49 = vpop.permute.xlu0 %4701  ;;  %1016 = vmatprep.mubr.f32.mxu1 %v7113_v30  ;;  %v1263_v28 = vsel %vm323_vm2, %v4698_v29, %v7115_v6 }
 0x165   : > { %v4704_v15 = vunpack.i.h.bf16 %v4702_v49  ;;  %v4703_v0 = vunpack.i.l.bf16 %v4702_v49  ;;  %v5527_v38 = vpop.permute.xlu1 %4706  ;;  %4198 = vmatpush1.bf16.msra.mxu1 %v5516_v2  ;;  %v5530_v34 = vpack.c.bf16 %v1263_v28, %v1261_v8 }
 0x166   : > { %v7122_v11 = vunpack.i.h.bf16 %v5527_v38  ;;  %v4708_v30 = vunpack.i.l.bf16 %v5527_v38 }
 0x167   : > { %v1260_v60 = vsel %vm323_vm2, %v4703_v0, %v4693_v25  ;;  %v1262_v36 = vsel %vm323_vm2, %v4704_v15, %v4698_v29  ;;  %4200 = vmatprep.subr.bf16.mxu1 %v5530_v34  ;;  %3556 = vmatmul.mubr.msk.f32.gmra.mrb[24].mxu1 %vm565_vm0, %v5247_v17 }
 0x168   : > { %v5539_v49 = vpack.c.bf16 %v1262_v36, %v1260_v60  ;;  %v5541_v6 = vpop.permute.xlu0 %4711  ;;  %1022 = vmatprep.mubr.f32.mxu1 %v7178_v37  ;;  %v1265_v36 = vsel %vm323_vm2, %v4708_v30, %v7122_v11 }
 0x169   : > { %v7121_v8 = vunpack.i.h.bf16 %v5541_v6  ;;  %v4713_v0 = vunpack.i.l.bf16 %v5541_v6  ;;  %v4717_v25 = vpop.permute.xlu1 %4716 }
 0x16a   : > { %v4719_v15 = vunpack.i.h.bf16 %v4717_v25  ;;  %v4718_v29 = vunpack.i.l.bf16 %v4717_v25  ;;  %4202 = vmatpush1.bf16.msra.mxu1 %v5539_v49 }
 0x16b   : > { %3557 = vmatmul.mubr.msk.f32.gmra.mrb[26].mxu1 %vm565_vm0, %v5267_v40  ;;  %v1267_v28 = vsel %vm323_vm2, %v4713_v0, %v7121_v8 }
 0x16c   : > { %v1266_v60 = vsel %vm323_vm2, %v4719_v15, %v4713_v0  ;;  %v1264_v3 = vsel %vm323_vm2, %v4718_v29, %v4708_v30  ;;  %v1245_v1 = vpop.permute.xlu0 %1244  ;;  %1028 = vmatprep.mubr.f32.mxu1 %v7178_v37  ;;  %v5558_v25 = vpack.c.bf16 %v1267_v28, %v1265_v36 }
 0x16d   : > { %v5560_v45 = vpack.c.bf16 %v1266_v60, %v1264_v3  ;;  %v5562_v56 = vpop.permute.xlu1 %1246 }
 0x16e   : > { %7179 = vst [vmem:[#allocation22_spill] sm:$0xff] %v5558_v25  ;;  %4204 = vmatprep.subr.bf16.mxu1 %v5558_v25  ;;  %v5570_v30 = vsel %vm323_vm2, %v1245_v1, %v5562_v56 }
 0x16f   : > { %7180 = vst [vmem:[#allocation23_spill] sm:$0xff] %v5560_v45  ;;  %3558 = vmatmul.mubr.msk.f32.gmra.mrb[28].mxu1 %vm565_vm0, %v5289_v47  ;;  %7181 = vst [vmem:[#allocation24_spill] sm:$0xff] %v5570_v30 }
 0x170   : > { %4206 = vmatpush1.bf16.msra.mxu1 %v5560_v45  ;;  %v1243_v8 = vpop.permute.xlu0 %1242  ;;  %1367 = vmatprep.mubr.f32.mxu1 %v7178_v37 }
 0x171   : > { %v5574_v0 = vsel %vm323_vm2, %v1243_v8, %v1245_v1  ;;  %v5576_v3 = vpop.permute.xlu1 %4721  ;;  %1323 = vmatprep.subr.mxu1 %v5570_v30  ;;  %v7183_v1 = vunpack.i.h.bf16 %v5420_v5  ;;  %v7184_v8 = vunpack.i.h.bf16 %v5422_v62  ;;  %v7185_v62 = vunpack.i.h.bf16 %v5458_v14 }
 0x172   : > { %7182 = vst [vmem:[#allocation25_spill] sm:$0xff] %v5574_v0  ;;  %v7125_v15 = vunpack.i.h.bf16 %v5576_v3  ;;  %v7126_v29 = vunpack.i.l.bf16 %v5576_v3 }
 0x173   : > { %v5592_v60 = vpack.c.bf16 %v7184_v8, %v7183_v1  ;;  %v7186_v1 = vunpack.i.h.bf16 %v5476_v31  ;;  %v7188_v31 = vunpack.i.h.bf16 %v5501_v58  ;;  %v7190_v58 = vunpack.i.h.bf16 %v5527_v38 }
 0x174   : > { %v4247_v36 = vpack.c.bf16 %v7125_v15, %v7126_v29  ;;  %1324 = vmatpush1.msra.mxu1 %v5574_v0  ;;  %v5586_v28 = vpop.permute.xlu0 %4726 }
 0x175   : > { %v7127_v11 = vunpack.i.h.bf16 %v5586_v28  ;;  %v7128_v33 = vunpack.i.l.bf16 %v5586_v28  ;;  %v5596_v48 = vpop.permute.xlu1 %4731  ;;  %3565 = vmatmul.mubr.msk.f32.vlgmr.msra.gmra.mrb[30].mxu1 %vm565_vm0, %v4966_v39  ;;  %4208 = vmatprep.subr.bf16.mxu1 %v5190_v42  ;;  %v5616_v8 = vpack.c.bf16 %v7186_v1, %v7185_v62  ;;  %v7189_v62 = vunpack.i.h.bf16 %v5510_v24 }
 0x176   : > { %v7130_v29 = vunpack.i.l.bf16 %v5596_v48  ;;  %4210 = vmatpush3.bf16.msra.mxu1 %v5190_v42  ;;  %4248 = vmatprep.subr.bf16.mxu0 %v4247_v36  ;;  %v7194_v30 = vunpack.i.l.bf16 %v5586_v28 }
 0x177   : > { %v4251_v5 = vpack.c.bf16 %v7127_v11, %v7128_v33  ;;  %4212 = vmatprep.subr.bf16.mxu1 %v5592_v60  ;;  %4250 = vmatpush3.bf16.msra.mxu0 %v4247_v36  ;;  %v7187_v36 = vunpack.i.h.bf16 %v5596_v48  ;;  %v5635_v1 = vpack.c.bf16 %v7189_v62, %v7188_v31  ;;  %v7191_v31 = vunpack.i.h.bf16 %v5541_v6 }
 0x178   : > { %1373 = vmatprep.mubr.f32.mxu1 %v7178_v37  ;;  %v5610_v39 = vpop.permute.xlu0 %4736 }
 0x179   : > { %v5618_v15 = vpop.permute.xlu1 %4741  ;;  %3566 = vmatmul.mubr.msk.f32.gmra.mrb[32].mxu1 %vm565_vm0, %v5213_v19  ;;  %4252 = vmatprep.subr.bf16.mxu0 %v4251_v5  ;;  %v4255_v11 = vpack.c.bf16 %v7187_v36, %v7130_v29  ;;  %v7132_v33 = vunpack.i.h.bf16 %v5610_v39  ;;  %v7133_v7 = vunpack.i.l.bf16 %v5610_v39  ;;  %v5652_v62 = vpack.c.bf16 %v7191_v31, %v7190_v58 }
 0x17a   : > { %4214 = vmatpush3.bf16.msra.mxu1 %v5592_v60  ;;  %1379 = vmatprep.mubr.f32.mxu1 %v7178_v37  ;;  %v7140_v12 = vunpack.i.h.bf16 %v5618_v15 }
 0x17b   : > { %4216 = vmatprep.subr.bf16.mxu1 %v5616_v8  ;;  %4254 = vmatpush3.bf16.msra.mxu0 %v4251_v5  ;;  %v4259_v29 = vpack.c.bf16 %v7132_v33, %v7133_v7  ;;  %v7141_v5 = vunpack.i.l.bf16 %v5618_v15 }
 0x17c   : > { %4256 = vmatprep.subr.bf16.mxu0 %v4255_v11  ;;  %v4747_v14 = vpop.permute.xlu0 %4746 }
 0x17d   : > { %v4752_v36 = vpop.permute.xlu1 %4751  ;;  %3567 = vmatmul.mubr.msk.f32.gmra.mrb[34].mxu1 %vm565_vm0, %v5229_v43  ;;  %v4263_v7 = vpack.c.bf16 %v7140_v12, %v7141_v5  ;;  %v4749_v52 = vunpack.i.h.bf16 %v4747_v14 }
 0x17e   : > { %4218 = vmatpush3.bf16.msra.mxu1 %v5616_v8  ;;  %1385 = vmatprep.mubr.f32.mxu1 %v7178_v37  ;;  %v4754_v38 = vunpack.i.h.bf16 %v4752_v36  ;;  %v4753_v6 = vunpack.i.l.bf16 %v4752_v36  ;;  %v7193_v36 = vunpack.i.h.bf16 %v5576_v3 }
 0x17f   : > { %4220 = vmatprep.subr.bf16.mxu1 %v5635_v1  ;;  %4258 = vmatpush3.bf16.msra.mxu0 %v4255_v11  ;;  %v4748_v11 = vunpack.i.l.bf16 %v4747_v14  ;;  %v7192_v14 = vunpack.i.l.bf16 %v5576_v3  ;;  %v7195_v3 = vunpack.i.h.bf16 %v5586_v28 }
 0x180   : > { %4260 = vmatprep.subr.bf16.mxu0 %v4259_v29  ;;  %v4757_v24 = vpop.permute.xlu0 %4756 }
 0x181   : > { %v5654_v33 = vpop.permute.xlu1 %1615  ;;  %3568 = vmatmul.mubr.msk.f32.gmra.mrb[36].mxu1 %vm565_vm0, %v5247_v17  ;;  %v4759_v58 = vunpack.i.h.bf16 %v4757_v24  ;;  %v4758_v31 = vunpack.i.l.bf16 %v4757_v24  ;;  %v1618_v12 = vsel %vm374_vm3, %v4748_v11, %v7192_v14  ;;  %v1619_v24 = vsel %vm374_vm3, %v4754_v38, %v4749_v52 }
 0x182   : > { %4222 = vmatpush3.bf16.msra.mxu1 %v5635_v1  ;;  %1391 = vmatprep.mubr.f32.mxu1 %v7178_v37  ;;  %v1617_v5 = vsel %vm374_vm3, %v4753_v6, %v4748_v11 }
 0x183   : > { %4224 = vmatprep.subr.bf16.mxu1 %v5652_v62  ;;  %4262 = vmatpush3.bf16.msra.mxu0 %v4259_v29  ;;  %v1620_v29 = vsel %vm374_vm3, %v4749_v52, %v7193_v36  ;;  %v1622_v14 = vsel %vm374_vm3, %v4758_v31, %v7194_v30  ;;  %v1624_v36 = vsel %vm374_vm3, %v4759_v58, %v7195_v3 }
 0x184   : > { %4264 = vmatprep.subr.bf16.mxu0 %v4263_v7  ;;  %v4762_v57 = vpop.permute.xlu0 %4761  ;;  %v4229_v30 = vpack.c.bf16 %v1619_v24, %v1617_v5  ;;  %v7196_v5 = vunpack.i.l.bf16 %v5596_v48 }
 0x185   : > { %v4767_v32 = vpop.permute.xlu1 %4766  ;;  %3569 = vmatmul.mubr.msk.f32.gmra.mrb[38].mxu1 %vm565_vm0, %v5267_v40  ;;  %v4764_v22 = vunpack.i.h.bf16 %v4762_v57  ;;  %v4763_v10 = vunpack.i.l.bf16 %v4762_v57  ;;  %v5691_v57 = vld [vmem:[%s7093_s1] sm:$0xff] }
 0x186   : > { %4226 = vmatpush3.bf16.msra.mxu1 %v5652_v62  ;;  %1397 = vmatprep.mubr.f32.mxu1 %v7178_v37  ;;  %v4769_v45 = vunpack.i.h.bf16 %v4767_v32  ;;  %v4768_v52 = vunpack.i.l.bf16 %v4767_v32  ;;  %v4231_v32 = vpack.c.bf16 %v1624_v36, %v1622_v14 }
 0x187   : > { %3910 = vmatprep.subr.mxu1 %v5562_v56  ;;  %4266 = vmatpush3.bf16.msra.mxu0 %v4263_v7  ;;  %v4227_v7 = vpack.c.bf16 %v1620_v29, %v1618_v12  ;;  %v1621_v28 = vsel %vm374_vm3, %v4763_v10, %v4758_v31  ;;  %v1623_v11 = vsel %vm374_vm3, %v4764_v22, %v4759_v58  ;;  %v7197_v22 = vunpack.i.h.bf16 %v5596_v48 }
 0x188   : > { %3941 = vmatprep.subr.mxu0 %v5654_v33  ;;  %v4772_v0 = vpop.permute.xlu0 %4771  ;;  %v1626_v10 = vsel %vm374_vm3, %v4768_v52, %v7196_v5  ;;  %v4233_v31 = vpack.c.bf16 %v1623_v11, %v1621_v28 }
 0x189   : > { %v4777_v38 = vpop.permute.xlu1 %4776  ;;  %3570 = vmatmul.mubr.msk.f32.gmra.mrb[40].mxu1 %vm565_vm0, %v5289_v47  ;;  %v4774_v12 = vunpack.i.h.bf16 %v4772_v0  ;;  %v4773_v6 = vunpack.i.l.bf16 %v4772_v0  ;;  %v1628_v0 = vsel %vm374_vm3, %v4769_v45, %v7197_v22  ;;  %v7200_v22 = vunpack.i.l.bf16 %v5618_v15 }
 0x18a   : > { %3911 = vmatpush3.msra.mxu1 %v5562_v56  ;;  %3912 = vmatprep.mubr.msk.f32.mxu1 %vm565_vm0, %v5691_v57  ;;  %v4779_v3 = vunpack.i.h.bf16 %v4777_v38  ;;  %v4778_v25 = vunpack.i.l.bf16 %v4777_v38  ;;  %v4235_v36 = vpack.c.bf16 %v1628_v0, %v1626_v10 }
 0x18b   : > { %4228 = vmatprep.subr.bf16.mxu1 %v4227_v7  ;;  %3942 = vmatpush3.msra.mxu0 %v5654_v33  ;;  %v1625_v24 = vsel %vm374_vm3, %v4773_v6, %v4768_v52  ;;  %v1627_v14 = vsel %vm374_vm3, %v4774_v12, %v4769_v45  ;;  %v7198_v7 = vunpack.i.l.bf16 %v5610_v39 }
 0x18c   : > { %4268 = vmatprep.subr.bf16.mxu0 %v4882_v4  ;;  %v4782_v29 = vpop.permute.xlu0 %4781  ;;  %3944 = vmatmul.mubr.msk.f32.vlgmr.msra.gmra.mrb[6].mxu0 %vm565_vm0, %v5213_v19  ;;  %v4237_v12 = vpack.c.bf16 %v1627_v14, %v1625_v24 }
 0x18d   : > { %3913 = vmatmul.mubr.msk.f32.vlgmr.msra.gmra.mrb[42].mxu1 %vm565_vm0, %v5213_v19  ;;  %4270 = vmatpush1.bf16.msra.mxu0 %v4892_v9  ;;  %v4787_v58 = vpop.permute.xlu1 %4786  ;;  %v4784_v48 = vunpack.i.h.bf16 %v4782_v29  ;;  %v4783_v38 = vunpack.i.l.bf16 %v4782_v29 }
 0x18e   : > { %4230 = vmatpush1.bf16.msra.mxu1 %v4229_v30  ;;  %4272 = vmatprep.subr.bf16.mxu0 %v5005_v53  ;;  %v1630_v30 = vsel %vm374_vm3, %v4778_v25, %v7198_v7  ;;  %v4789_v45 = vunpack.i.h.bf16 %v4787_v58  ;;  %v4788_v28 = vunpack.i.l.bf16 %v4787_v58  ;;  %v7201_v58 = vunpack.i.h.bf16 %v5618_v15  ;;  %v5760_v7 = vld [vmem:[%s7093_s1 + $0x30] sm:$0xff] }
 0x18f   : > { %4232 = vmatprep.subr.bf16.mxu1 %v4231_v32  ;;  %3915 = vmatprep.mubr.msk.f32.mxu1 %vm565_vm0, %v5229_v43  ;;  %v7199_v32 = vunpack.i.h.bf16 %v5610_v39  ;;  %v1629_v39 = vsel %vm374_vm3, %v4783_v38, %v4778_v25  ;;  %v1631_v29 = vsel %vm374_vm3, %v4784_v48, %v4779_v3 }
 0x190   : > { %3946 = vmatprep.mubr.msk.f32.mxu0 %vm565_vm0, %v5229_v43  ;;  %v4792_v11 = vpop.permute.xlu0 %4791  ;;  %v1634_v0 = vsel %vm374_vm3, %v4788_v28, %v7200_v22  ;;  %v1636_v25 = vsel %vm374_vm3, %v4789_v45, %v7201_v58  ;;  %v3101_v58 = vld [vmem:[%s7094_s2] sm:$0xff] }
 0x191   : > { %3916 = vmatmul.mubr.msk.f32.gmra.mrb[44].mxu1 %vm565_vm0, %v5247_v17  ;;  %4274 = vmatpush1.bf16.msra.mxu0 %v5018_v61  ;;  %v1632_v52 = vsel %vm374_vm3, %v4779_v3, %v7199_v32  ;;  %v4794_v5 = vunpack.i.h.bf16 %v4792_v11  ;;  %v4793_v10 = vunpack.i.l.bf16 %v4792_v11  ;;  %v4241_v3 = vpack.c.bf16 %v1631_v29, %v1629_v39  ;;  %v1614_v15 = vpop.permute.xlu1 %1613  ;;  %v7205_v29 = vld [vmem:[#allocation23_spill] sm:$0xff] }
 0x192   : > { %4234 = vmatpush1.bf16.msra.mxu1 %v4233_v31  ;;  %4276 = vmatprep.subr.bf16.mxu0 %v5051_v18  ;;  %v4239_v6 = vpack.c.bf16 %v1632_v52, %v1630_v30  ;;  %v4243_v14 = vpack.c.bf16 %v1636_v25, %v1634_v0  ;;  %v1638_v38 = vsel %vm374_vm3, %v1614_v15, %v5654_v33  ;;  %v7202_v33 = vlaneseq  ;;  %v5959_v0 = vld [vmem:[#allocation2 + $0xf8] sm:$0xff]  ;;  %v5968_v25 = vld [vmem:[%s7093_s1 + $0x60] sm:$0xff] }
 0x193   : > { %4236 = vmatprep.subr.bf16.mxu1 %v4235_v36  ;;  %3947 = vmatmul.mubr.msk.f32.gmra.mrb[8].mxu0 %vm565_vm0, %v5247_v17  ;;  %v1633_v31 = vsel %vm374_vm3, %v4793_v10, %v4788_v28  ;;  %v1635_v24 = vsel %vm374_vm3, %v4794_v5, %v4789_v45  ;;  %v4818_v32 = vmov 0   ;;  %v7203_v45 = vld [vmem:[#allocation4_spill] sm:$0xff] }
 0x194   : > { %3918 = vmatprep.mubr.msk.f32.mxu1 %vm565_vm0, %v5267_v40  ;;  %3949 = vmatprep.mubr.msk.f32.mxu0 %vm565_vm0, %v5267_v40  ;;  %v4245_v36 = vpack.c.bf16 %v1635_v24, %v1633_v31  ;;  %v1612_v48 = vpop.permute.xlu0 %1611  ;;  %v7206_v10 = vld [vmem:[#allocation24_spill] sm:$0xff] }
 0x195   : > { %3919 = vmatmul.mubr.msk.f32.gmra.mrb[46].mxu1 %vm565_vm0, %v5289_v47  ;;  %4278 = vmatpush1.bf16.msra.mxu0 %v5064_v26  ;;  %v1637_v30 = vsel %vm374_vm3, %v1612_v48, %v1614_v15  ;;  %v5973_v24 = vld [vmem:[#allocation2 + $0xf0] sm:$0xff]  ;;  %v7208_v15 = vld [vmem:[#allocation3_spill] sm:$0xff] }
 0x196   : > { %4238 = vmatpush1.bf16.msra.mxu1 %v4237_v12  ;;  %4280 = vmatprep.subr.bf16.mxu0 %v5093_v41  ;;  %v5843_v12 = vld [vmem:[%s7093_s1 + $0x50] sm:$0xff] }
 0x197   : > { %4240 = vmatprep.subr.bf16.mxu1 %v4239_v6  ;;  %3950 = vmatmul.mubr.msk.f32.gmra.mrb[10].mxu0 %vm565_vm0, %v5289_v47 }
 0x198   : > { %1736 = vmatprep.mubr.f32.mxu1 %v7178_v37  ;;  %2009 = vmatprep.mubr.f32.mxu0 %v7178_v37 }
 0x199   : > { %4282 = vmatpush1.bf16.msra.mxu0 %v5106_v59  ;;  %4795 = vset.pattern.permute.xlu1 %v4818_v32 }
 0x19a   : > { %4242 = vmatpush1.bf16.msra.mxu1 %v4241_v3  ;;  %4284 = vmatprep.subr.bf16.mxu0 %v5149_v63  ;;  %v7207_v3 = vld [vmem:[#allocation25_spill] sm:$0xff] }
 0x19b   : > { %4244 = vmatprep.subr.bf16.mxu1 %v4243_v14  ;;  %4796 = vset.pattern.permute.xlu0 %v4818_v32 }
 0x19c   : > { %3109 = vperm.xlu1 %4795, %v3101_v58   ;;  %v7212_v58 = vld [vmem:[#allocation16_spill] sm:$0xff] }
 0x19d   : > { %4286 = vmatpush1.bf16.msra.mxu0 %v5167_v23 }
 0x19e   : > { %4246 = vmatpush1.bf16.msra.mxu1 %v4245_v36  ;;  %1965 = vmatprep.subr.mxu0 %v5184_v21  ;;  %v5781_v21 = vld [vmem:[%s7095_s3 + $0x1] ss:$2 sm:$0x7]  ;;  %v5990_v36 = vld [vmem:[%s7093_s1 + $0x68] sm:$0xff] }
 0x19f   : > { %1692 = vmatprep.subr.mxu1 %v1638_v38  ;;  %vm524_vm10 = vcmp.eq.f32.partialorder %v5781_v21, 1.0  ;;  %v7209_v38 = vld [vmem:[#allocation7_spill] sm:$0xff] }
 0x1a1   : > { %1966 = vmatpush1.msra.mxu0 %v5188_v55  ;;  %v5776_v55 = vld [vmem:[%s7093_s1 + $0x38] sm:$0xff] }
 0x1a2   : > { %1693 = vmatpush1.msra.mxu1 %v1637_v30  ;;  %3595 = vmatmul.mubr.msk.f32.vlgmr.msra.gmra.mrb[12].mxu0 %vm565_vm0, %v5760_v7  ;;  %v6009_v30 = vld [vmem:[%s7093_s1 + $0x70] sm:$0xff] }
 0x1a3   : > { %3577 = vmatmul.mubr.msk.f32.vlgmr.msra.gmra.mrb[48].mxu1 %vm565_vm0, %v5691_v57  ;;  %4288 = vmatprep.subr.bf16.mxu1 %v5182_v13  ;;  %v1132_v57 = vshrl.u32 %v7202_v33, 7 }
 0x1a4   : > { %4328 = vmatprep.subr.bf16.mxu0 %v5190_v42  ;;  %4290 = vmatpush3.bf16.msra.mxu1 %v5182_v13 }
 0x1a5   : > { %4330 = vmatpush3.bf16.msra.mxu0 %v5190_v42  ;;  %4292 = vmatprep.subr.bf16.mxu1 %v4997_v51  ;;  %v5798_v42 = vld [vmem:[%s7093_s1 + $0x40] sm:$0xff]  ;;  %v5826_v28 = vsub.s32 0, %v1132_v57  ;;  %v5836_v11 = vsub.s32 1, %v1132_v57 }
 0x1a6   : > { %4332 = vmatprep.subr.bf16.mxu0 %v5592_v60  ;;  %1742 = vmatprep.mubr.f32.mxu1 %v7178_v37 }
 0x1a7   : > { %2015 = vmatprep.mubr.f32.mxu0 %v7178_v37  ;;  %3578 = vmatmul.mubr.msk.f32.gmra.mrb[50].mxu1 %vm565_vm0, %v5213_v19  ;;  %v5802_v19 = vsub.s32 2, %v1132_v57  ;;  %v7210_v57 = vld [vmem:[#allocation10_spill] sm:$0xff] }
 0x1a8   : > { %3596 = vmatmul.mubr.msk.f32.gmra.mrb[14].mxu0 %vm565_vm0, %v5776_v55  ;;  %4294 = vmatpush3.bf16.msra.mxu1 %v4997_v51 }
 0x1a9   : > { %4334 = vmatpush3.bf16.msra.mxu0 %v5592_v60  ;;  %4296 = vmatprep.subr.bf16.mxu1 %v5043_v16  ;;  %v5810_v60 = vsel %vm524_vm10, 1, %v4818_v32 }
 0x1aa   : > { %4336 = vmatprep.subr.bf16.mxu0 %v5616_v8  ;;  %1748 = vmatprep.mubr.f32.mxu1 %v7178_v37  ;;  %v1142_v52 = vrot.slane %v5810_v60, %v5802_v19 }
 0x1ab   : > { %2021 = vmatprep.mubr.f32.mxu0 %v7178_v37  ;;  %3579 = vmatmul.mubr.msk.f32.gmra.mrb[52].mxu1 %vm565_vm0, %v5229_v43  ;;  %v5822_v43 = vld [vmem:[%s7093_s1 + $0x48] sm:$0xff] }
 0x1ac   : > { %3597 = vmatmul.mubr.msk.f32.gmra.mrb[16].mxu0 %vm565_vm0, %v5798_v42  ;;  %4298 = vmatpush3.bf16.msra.mxu1 %v5043_v16  ;;  %vm6254_vm13 = vcmp.eq.s32.totalorder %v1142_v52, 1  ;;  %v3187_v52 = vld [vmem:[%s7096_s4 + $0x70] sm:$0xff] }
 0x1ad   : > { %4338 = vmatpush3.bf16.msra.mxu0 %v5616_v8  ;;  %4300 = vmatprep.subr.bf16.mxu1 %v7203_v45  ;;  %v1134_v8 = vrot.slane %v5810_v60, %v5826_v28 }
 0x1ae   : > { %4340 = vmatprep.subr.bf16.mxu0 %v5635_v1  ;;  %1754 = vmatprep.mubr.f32.mxu1 %v7178_v37 }
 0x1af   : > { %2027 = vmatprep.mubr.f32.mxu0 %v7178_v37  ;;  %3580 = vmatmul.mubr.msk.f32.gmra.mrb[54].mxu1 %vm565_vm0, %v5247_v17  ;;  %v1138_v17 = vrot.slane %v5810_v60, %v5836_v11  ;;  %vm6280_vm14 = vcmp.eq.s32.totalorder %v1134_v8, 1  ;;  %v3192_v8 = vld [vmem:[%s7096_s4 + $0x98] sm:$0xff]  ;;  %v3189_v60 = vld [vmem:[%s7096_s4 + $0x80] sm:$0xff] }
 0x1b0   : > { %3598 = vmatmul.mubr.msk.f32.gmra.mrb[18].mxu0 %vm565_vm0, %v5822_v43  ;;  %4302 = vmatpush3.bf16.msra.mxu1 %v7203_v45 }
 0x1b1   : > { %4342 = vmatpush3.bf16.msra.mxu0 %v5635_v1  ;;  %4304 = vmatprep.subr.bf16.mxu1 %v5255_v46  ;;  %v5860_v1 = vld [vmem:[%s7093_s1 + $0x58] sm:$0xff]  ;;  %vm6290_vm15 = vcmp.eq.s32.totalorder %v1138_v17, 1  ;;  %v3191_v17 = vld [vmem:[%s7096_s4 + $0x90] sm:$0xff] }
 0x1b2   : > { %4344 = vmatprep.subr.bf16.mxu0 %v5652_v62  ;;  %1760 = vmatprep.mubr.f32.mxu1 %v7178_v37 }
 0x1b3   : > { %2033 = vmatprep.mubr.f32.mxu0 %v7178_v37  ;;  %3581 = vmatmul.mubr.msk.f32.gmra.mrb[56].mxu1 %vm565_vm0, %v5267_v40 }
 0x1b4   : > { %3599 = vmatmul.mubr.msk.f32.gmra.mrb[20].mxu0 %vm565_vm0, %v5843_v12  ;;  %4306 = vmatpush3.bf16.msra.mxu1 %v5255_v46 }
 0x1b5   : > { %4346 = vmatpush3.bf16.msra.mxu0 %v5652_v62  ;;  %3972 = vmatprep.subr.mxu1 %v5186_v20 }
 0x1b6   : > { %4003 = vmatprep.subr.mxu0 %v5562_v56  ;;  %1766 = vmatprep.mubr.f32.mxu1 %v7178_v37 }
 0x1b7   : > { %2039 = vmatprep.mubr.f32.mxu0 %v7178_v37  ;;  %3582 = vmatmul.mubr.msk.f32.gmra.mrb[58].mxu1 %vm565_vm0, %v5289_v47 }
 0x1b8   : > { %3600 = vmatmul.mubr.msk.f32.gmra.mrb[22].mxu0 %vm565_vm0, %v5860_v1  ;;  %3973 = vmatpush3.msra.mxu1 %v5186_v20  ;;  %v5870_v40 = vpop.f32.mrb[0].mxu1 }
 0x1b9   : > { %4004 = vmatpush3.msra.mxu0 %v5562_v56  ;;  %4308 = vmatprep.subr.bf16.mxu1 %v5198_v54  ;;  %v5874_v62 = vpop.f32.mrb[1].mxu1 }
 0x1ba   : > { %3974 = vmatprep.mubr.msk.f32.mxu1 %vm565_vm0, %v5760_v7  ;;  %4005 = vmatprep.mubr.msk.f32.mxu0 %vm565_vm0, %v5760_v7 }
 0x1bb   : > { %4348 = vmatprep.subr.bf16.mxu0 %v4882_v4  ;;  %3975 = vmatmul.mubr.msk.f32.vlgmr.msra.gmra.mrb[60].mxu1 %vm565_vm0, %v5776_v55 }
 0x1bc   : > { %4310 = vmatpush1.bf16.msra.mxu1 %v5215_v27  ;;  %4006 = vmatmul.mubr.msk.f32.vlgmr.msra.gmra.mrb[24].mxu0 %vm565_vm0, %v5776_v55  ;;  %v5886_v20 = vpop.f32.mrb[2].mxu1 }
 0x1bd   : > { %4350 = vmatpush1.bf16.msra.mxu0 %v4892_v9  ;;  %4312 = vmatprep.subr.bf16.mxu1 %v5478_v50  ;;  %v5890_v54 = vpop.f32.mrb[3].mxu1 }
 0x1be   : > { %4352 = vmatprep.subr.bf16.mxu0 %v5005_v53  ;;  %3977 = vmatprep.mubr.msk.f32.mxu1 %vm565_vm0, %v5798_v42 }
 0x1bf   : > { %3978 = vmatmul.mubr.msk.f32.gmra.mrb[62].mxu1 %vm565_vm0, %v5822_v43  ;;  %4008 = vmatprep.mubr.msk.f32.mxu0 %vm565_vm0, %v5798_v42 }
 0x1c0   : > { %4314 = vmatpush1.bf16.msra.mxu1 %v5487_v44  ;;  %4009 = vmatmul.mubr.msk.f32.gmra.mrb[26].mxu0 %vm565_vm0, %v5822_v43  ;;  %v5902_v27 = vpop.f32.mrb[4].mxu1  ;;  %v5927_v44 = vld [vmem:[%s7095_s3] ss:$2 sm:$0x7] }
 0x1c1   : > { %4354 = vmatpush1.bf16.msra.mxu0 %v5018_v61  ;;  %4316 = vmatprep.subr.bf16.mxu1 %v5504_v35  ;;  %v5906_v47 = vpop.f32.mrb[5].mxu1  ;;  %vm521_vm11 = vcmp.eq.f32.partialorder %v5927_v44, 1.0  ;;  %v7216_v44 = vld [vmem:[#allocation8_spill] sm:$0xff] }
 0x1c2   : > { %4356 = vmatprep.subr.bf16.mxu0 %v5051_v18  ;;  %3980 = vmatprep.mubr.msk.f32.mxu1 %vm565_vm0, %v5843_v12  ;;  %vm525_vm12 = vmand %vm521_vm11, %vm524_vm10 }
 0x1c3   : > { %3981 = vmatmul.mubr.msk.f32.gmra.mrb[64].mxu1 %vm565_vm0, %v5860_v1  ;;  %4011 = vmatprep.mubr.msk.f32.mxu0 %vm565_vm0, %v5843_v12 }
 0x1c4   : > { %4318 = vmatpush1.bf16.msra.mxu1 %v5516_v2  ;;  %4012 = vmatmul.mubr.msk.f32.gmra.mrb[28].mxu0 %vm565_vm0, %v5860_v1  ;;  %v5918_v56 = vpop.f32.mrb[6].mxu1  ;;  %v5940_v2 = vsel %vm521_vm11, 1, %v4818_v32 }
 0x1c5   : > { %4358 = vmatpush1.bf16.msra.mxu0 %v5064_v26  ;;  %4320 = vmatprep.subr.bf16.mxu1 %v5530_v34  ;;  %v5922_v50 = vpop.f32.mrb[7].mxu1  ;;  %v7204_v34 = vld [vmem:[#allocation22_spill] sm:$0xff]  ;;  %v1503_v39 = vrot.slane %v5940_v2, %v5826_v28 }
 0x1c6   : > { %4360 = vmatprep.subr.bf16.mxu0 %v5093_v41  ;;  %2223 = vmatprep.mubr.f32.mxu1 %v7178_v37 }
 0x1c7   : > { %2480 = vmatprep.mubr.f32.mxu0 %v7178_v37 }
 0x1c8   : > { %4322 = vmatpush1.bf16.msra.mxu1 %v5539_v49  ;;  %v5935_v35 = vpop.f32.mrb[8].mxu1  ;;  %v1507_v49 = vrot.slane %v5940_v2, %v5836_v11 }
 0x1c9   : > { %4362 = vmatpush1.bf16.msra.mxu0 %v5106_v59  ;;  %4324 = vmatprep.subr.bf16.mxu1 %v7204_v34  ;;  %v5945_v6 = vpop.f32.mrb[9].mxu1  ;;  %v6028_v34 = vld [vmem:[%s7093_s1 + $0x78] sm:$0xff] }
 0x1ca   : > { %4364 = vmatprep.subr.bf16.mxu0 %v5149_v63  ;;  %vm6468_vm1 = vcmp.eq.s32.totalorder %v1507_v49, 1  ;;  %v3217_v49 = vld [vmem:[%s7096_s4 + $0x160] sm:$0xff] }
 0x1cc   : > { %4326 = vmatpush1.bf16.msra.mxu1 %v7205_v29  ;;  %v5953_v5 = vpop.f32.mrb[10].mxu1  ;;  %v7211_v29 = vld [vmem:[#allocation13_spill] sm:$0xff] }
 0x1cd   : > { %4366 = vmatpush1.bf16.msra.mxu0 %v5167_v23  ;;  %2179 = vmatprep.subr.mxu1 %v7206_v10  ;;  %v5957_v22 = vpop.f32.mrb[11].mxu1  ;;  %v1511_v10 = vrot.slane %v5940_v2, %v5802_v19 }
 0x1ce   : > { %2436 = vmatprep.subr.mxu0 %v5959_v0 }
 0x1cf   : > { %vm6599_vm3 = vcmp.eq.s32.totalorder %v1511_v10, 1 }
 0x1d0   : > { %2180 = vmatpush1.msra.mxu1 %v7207_v3  ;;  %v5971_v31 = vpop.f32.mrb[12].mxu1  ;;  %v6069_v3 = vsel %vm525_vm12, 1, %v4818_v32  ;;  %v7214_v32 = vld [vmem:[#allocation5_spill] sm:$0xff] }
 0x1d1   : > { %2437 = vmatpush1.msra.mxu0 %v5973_v24  ;;  %3607 = vmatmul.mubr.msk.f32.vlgmr.msra.gmra.mrb[66].mxu1 %vm565_vm0, %v5760_v7  ;;  %v5978_v14 = vpop.f32.mrb[13].mxu1  ;;  %v1880_v21 = vrot.slane %v6069_v3, %v5802_v19 }
 0x1d2   : > { %3625 = vmatmul.mubr.msk.f32.vlgmr.msra.gmra.mrb[30].mxu0 %vm565_vm0, %v5968_v25  ;;  %4368 = vmatprep.subr.bf16.mxu1 %v5182_v13 }
 0x1d3   : > { %4408 = vmatprep.subr.bf16.mxu0 %v7208_v15  ;;  %4370 = vmatpush3.bf16.msra.mxu1 %v5182_v13  ;;  %vm6587_vm2 = vcmp.eq.s32.totalorder %v1880_v21, 1 }
 0x1d4   : > { %4410 = vmatpush3.bf16.msra.mxu0 %v7208_v15  ;;  %4372 = vmatprep.subr.bf16.mxu1 %v4997_v51  ;;  %v5992_v48 = vpop.f32.mrb[14].mxu1  ;;  %v7213_v15 = vld [vmem:[#allocation19_spill] sm:$0xff] }
 0x1d5   : > { %4412 = vmatprep.subr.bf16.mxu0 %v7209_v38  ;;  %2229 = vmatprep.mubr.f32.mxu1 %v7178_v37  ;;  %v5996_v7 = vpop.f32.mrb[15].mxu1 }
 0x1d6   : > { %2486 = vmatprep.mubr.f32.mxu0 %v7178_v37  ;;  %3608 = vmatmul.mubr.msk.f32.gmra.mrb[68].mxu1 %vm565_vm0, %v5776_v55 }
 0x1d7   : > { %3626 = vmatmul.mubr.msk.f32.gmra.mrb[32].mxu0 %vm565_vm0, %v5990_v36  ;;  %4374 = vmatpush3.bf16.msra.mxu1 %v4997_v51 }
 0x1d8   : > { %4414 = vmatpush3.bf16.msra.mxu0 %v7209_v38  ;;  %4376 = vmatprep.subr.bf16.mxu1 %v5043_v16  ;;  %v6011_v33 = vpop.f32.mrb[16].mxu1  ;;  %v3102_v38 = vld [vmem:[%s7094_s2 + $0x8] sm:$0xff] }
 0x1d9   : > { %4416 = vmatprep.subr.bf16.mxu0 %v7210_v57  ;;  %2235 = vmatprep.mubr.f32.mxu1 %v7178_v37  ;;  %v6015_v55 = vpop.f32.mrb[17].mxu1 }
 0x1da   : > { %2492 = vmatprep.mubr.f32.mxu0 %v7178_v37  ;;  %3609 = vmatmul.mubr.msk.f32.gmra.mrb[70].mxu1 %vm565_vm0, %v5798_v42  ;;  %v6043_v42 = vld [vmem:[%s7093_s1 + $0x80] sm:$0xff] }
 0x1db   : > { %3627 = vmatmul.mubr.msk.f32.gmra.mrb[34].mxu0 %vm565_vm0, %v6009_v30  ;;  %4378 = vmatpush3.bf16.msra.mxu1 %v5043_v16 }
 0x1dc   : > { %4418 = vmatpush3.bf16.msra.mxu0 %v7210_v57  ;;  %4380 = vmatprep.subr.bf16.mxu1 %v7203_v45  ;;  %v1872_v57 = vrot.slane %v6069_v3, %v5826_v28 }
 0x1dd   : > { %4420 = vmatprep.subr.bf16.mxu0 %v7211_v29  ;;  %2241 = vmatprep.mubr.f32.mxu1 %v7178_v37 }
 0x1de   : > { %2498 = vmatprep.mubr.f32.mxu0 %v7178_v37  ;;  %3610 = vmatmul.mubr.msk.f32.gmra.mrb[72].mxu1 %vm565_vm0, %v5822_v43  ;;  %v6060_v43 = vld [vmem:[#allocation2 + $0x100] sm:$0xff]  ;;  %vm6657_vm4 = vcmp.eq.s32.totalorder %v1872_v57, 1 }
 0x1df   : > { %3628 = vmatmul.mubr.msk.f32.gmra.mrb[36].mxu0 %vm565_vm0, %v6028_v34  ;;  %4382 = vmatpush3.bf16.msra.mxu1 %v7203_v45 }
 0x1e0   : > { %4422 = vmatpush3.bf16.msra.mxu0 %v7211_v29  ;;  %4384 = vmatprep.subr.bf16.mxu1 %v5255_v46  ;;  %v7221_v29 = vld [vmem:[#allocation15_spill] sm:$0xff] }
 0x1e1   : > { %4424 = vmatprep.subr.bf16.mxu0 %v7212_v58  ;;  %2247 = vmatprep.mubr.f32.mxu1 %v7178_v37 }
 0x1e2   : > { %2504 = vmatprep.mubr.f32.mxu0 %v7178_v37  ;;  %3611 = vmatmul.mubr.msk.f32.gmra.mrb[74].mxu1 %vm565_vm0, %v5843_v12  ;;  %v6066_v12 = vld [vmem:[%s7093_s1 + $0x88] sm:$0xff] }
 0x1e3   : > { %3629 = vmatmul.mubr.msk.f32.gmra.mrb[38].mxu0 %vm565_vm0, %v6043_v42  ;;  %4386 = vmatpush3.bf16.msra.mxu1 %v5255_v46 }
 0x1e4   : > { %4426 = vmatpush3.bf16.msra.mxu0 %v7212_v58  ;;  %4034 = vmatprep.subr.mxu1 %v6060_v43  ;;  %v7222_v58 = vld [vmem:[#allocation17_spill] sm:$0xff] }
 0x1e5   : > { %4065 = vmatprep.subr.mxu0 %v7213_v15  ;;  %2253 = vmatprep.mubr.f32.mxu1 %v7178_v37 }
 0x1e6   : > { %2510 = vmatprep.mubr.f32.mxu0 %v7178_v37  ;;  %3612 = vmatmul.mubr.msk.f32.gmra.mrb[76].mxu1 %vm565_vm0, %v5860_v1  ;;  %v7215_v1 = vld [vmem:[#allocation6_spill] sm:$0xff] }
 0x1e7   : > { %3630 = vmatmul.mubr.msk.f32.gmra.mrb[40].mxu0 %vm565_vm0, %v6066_v12  ;;  %4035 = vmatpush3.msra.mxu1 %v6060_v43 }
 0x1e8   : > { %4066 = vmatpush3.msra.mxu0 %v7213_v15  ;;  %4388 = vmatprep.subr.bf16.mxu1 %v7214_v32  ;;  %v1876_v15 = vrot.slane %v6069_v3, %v5836_v11  ;;  %v7223_v32 = vld [vmem:[#allocation18_spill] sm:$0xff] }
 0x1e9   : > { %4036 = vmatprep.mubr.msk.f32.mxu1 %vm565_vm0, %v5968_v25  ;;  %4067 = vmatprep.mubr.msk.f32.mxu0 %vm565_vm0, %v5968_v25 }
 0x1ea   : > { %4428 = vmatprep.subr.bf16.mxu0 %v4882_v4  ;;  %4037 = vmatmul.mubr.msk.f32.vlgmr.msra.gmra.mrb[78].mxu1 %vm565_vm0, %v5990_v36  ;;  %v7217_v4 = vld [vmem:[#allocation9_spill] sm:$0xff]  ;;  %vm6664_vm5 = vcmp.eq.s32.totalorder %v1876_v15, 1 }
 0x1eb   : > { %4390 = vmatpush1.bf16.msra.mxu1 %v7215_v1  ;;  %4068 = vmatmul.mubr.msk.f32.vlgmr.msra.gmra.mrb[42].mxu0 %vm565_vm0, %v5990_v36  ;;  %v3106_v1 = vld [vmem:[%s7094_s2 + $0x28] sm:$0xff] }
 0x1ec   : > { %4430 = vmatpush1.bf16.msra.mxu0 %v4892_v9  ;;  %4392 = vmatprep.subr.bf16.mxu1 %v7216_v44  ;;  %v7218_v9 = vld [vmem:[#allocation11_spill] sm:$0xff]  ;;  %v7225_v44 = vld [vmem:[#allocation21_spill] sm:$0xff] }
 0x1ed   : > { %4432 = vmatprep.subr.bf16.mxu0 %v5005_v53  ;;  %4039 = vmatprep.mubr.msk.f32.mxu1 %vm565_vm0, %v6009_v30  ;;  %v7219_v53 = vld [vmem:[#allocation12_spill] sm:$0xff] }
 0x1ee   : > { %4040 = vmatmul.mubr.msk.f32.gmra.mrb[80].mxu1 %vm565_vm0, %v6028_v34  ;;  %4070 = vmatprep.mubr.msk.f32.mxu0 %vm565_vm0, %v6009_v30 }
 0x1ef   : > { %4394 = vmatpush1.bf16.msra.mxu1 %v7217_v4  ;;  %4071 = vmatmul.mubr.msk.f32.gmra.mrb[44].mxu0 %vm565_vm0, %v6028_v34  ;;  %v3179_v4 = vld [vmem:[%s7096_s4 + $0x30] sm:$0xff] }
 0x1f0   : > { %4434 = vmatpush1.bf16.msra.mxu0 %v5018_v61  ;;  %4396 = vmatprep.subr.bf16.mxu1 %v7218_v9  ;;  %v3103_v61 = vld [vmem:[%s7094_s2 + $0x10] sm:$0xff] }
 0x1f1   : > { %4436 = vmatprep.subr.bf16.mxu0 %v5051_v18  ;;  %4042 = vmatprep.mubr.msk.f32.mxu1 %vm565_vm0, %v6043_v42  ;;  %v7220_v18 = vld [vmem:[#allocation14_spill] sm:$0xff] }
 0x1f2   : > { %4043 = vmatmul.mubr.msk.f32.gmra.mrb[82].mxu1 %vm565_vm0, %v6066_v12  ;;  %4073 = vmatprep.mubr.msk.f32.mxu0 %vm565_vm0, %v6043_v42 }
 0x1f3   : > { %4398 = vmatpush1.bf16.msra.mxu1 %v7219_v53  ;;  %4074 = vmatmul.mubr.msk.f32.gmra.mrb[46].mxu0 %vm565_vm0, %v6066_v12  ;;  %v3182_v53 = vld [vmem:[%s7096_s4 + $0x48] sm:$0xff] }
 0x1f4   : > { %4438 = vmatpush1.bf16.msra.mxu0 %v5064_v26  ;;  %4400 = vmatprep.subr.bf16.mxu1 %v7220_v18  ;;  %v3104_v26 = vld [vmem:[%s7094_s2 + $0x18] sm:$0xff] }
 0x1f5   : > { %4440 = vmatprep.subr.bf16.mxu0 %v5093_v41  ;;  %2694 = vmatprep.mubr.f32.mxu1 %v7178_v37  ;;  %v3105_v41 = vld [vmem:[%s7094_s2 + $0x20] sm:$0xff] }
 0x1f6   : > { %2951 = vmatprep.mubr.f32.mxu0 %v7178_v37  ;;  %3119 = vperm.xlu1 %4795, %v3103_v61   ;;  %v3184_v61 = vld [vmem:[%s7096_s4 + $0x58] sm:$0xff] }
 0x1f7   : > { %4402 = vmatpush1.bf16.msra.mxu1 %v7221_v29  ;;  %3114 = vperm.xlu0 %4796, %v3102_v38   ;;  %v4475_v18 = vpack.c.bf16 %v3184_v61, %v3182_v53  ;;  %v3181_v38 = vld [vmem:[%s7096_s4 + $0x40] sm:$0xff]  ;;  %v3183_v29 = vld [vmem:[%s7096_s4 + $0x50] sm:$0xff] }
 0x1f8   : > { %4442 = vmatpush1.bf16.msra.mxu0 %v5106_v59  ;;  %4404 = vmatprep.subr.bf16.mxu1 %v7222_v58  ;;  %v7224_v59 = vld [vmem:[#allocation20_spill] sm:$0xff] }
 0x1f9   : > { %4444 = vmatprep.subr.bf16.mxu0 %v5149_v63  ;;  %v3649_v63 = vld [vmem:[%s7093_s1 + $0x90] sm:$0xff] }
 0x1fa   : > { %3124 = vperm.xlu1 %4795, %v3104_v26   ;;  %v4477_v26 = vpack.c.bf16 %v3183_v29, %v3181_v38 }
 0x1fb   : > { %4406 = vmatpush1.bf16.msra.mxu1 %v7223_v32  ;;  %3129 = vperm.xlu0 %4796, %v3105_v41   ;;  %v3186_v41 = vld [vmem:[%s7096_s4 + $0x68] sm:$0xff]  ;;  %v3188_v32 = vld [vmem:[%s7096_s4 + $0x78] sm:$0xff] }
 0x1fc   : > { %4446 = vmatpush1.bf16.msra.mxu0 %v5167_v23  ;;  %2650 = vmatprep.subr.mxu1 %v7224_v59  ;;  %v3650_v23 = vld [vmem:[%s7093_s1 + $0x98] sm:$0xff]  ;;  %v4479_v59 = vpack.c.bf16 %v3188_v32, %v3186_v41 }
 0x1fd   : > { %2907 = vmatprep.subr.mxu0 %v5959_v0  ;;  %v3176_v0 = vld [vmem:[%s7096_s4 + $0x18] sm:$0xff] }
 0x1fe   : > { %3134 = vperm.xlu1 %4795, %v3106_v1  }
 0x1ff   : > { %2651 = vmatpush1.msra.mxu1 %v7225_v44  ;;  %v3185_v44 = vld [vmem:[%s7096_s4 + $0x60] sm:$0xff] }
 0x200   : > { %2908 = vmatpush1.msra.mxu0 %v5973_v24  ;;  %3637 = vmatmul.mubr.msk.f32.vlgmr.msra.gmra.mrb[84].mxu1 %vm565_vm0, %v5968_v25  ;;  %v3173_v25 = vld [vmem:[%s7096_s4] sm:$0xff] }
 0x201   : > { %4448 = vmatprep.subr.bf16.mxu1 %v5182_v13  ;;  %2700 = vmatprep.mubr.f32.mxu1 %v7178_v37 }
 0x202   : > { %4450 = vmatpush3.bf16.msra.mxu1 %v5182_v13  ;;  %3655 = vmatmul.mubr.msk.f32.vlgmr.msra.gmra.mrb[48].mxu0 %vm565_vm0, %v3649_v63  ;;  %v3651_v13 = vld [vmem:[%s7093_s1 + $0xa0] sm:$0xff] }
 0x203   : > { %4452 = vmatprep.subr.bf16.mxu1 %v4997_v51  ;;  %2957 = vmatprep.mubr.f32.mxu0 %v7178_v37 }
 0x204   : > { %3638 = vmatmul.mubr.msk.f32.gmra.mrb[86].mxu1 %vm565_vm0, %v5990_v36  ;;  %v3175_v36 = vld [vmem:[%s7096_s4 + $0x10] sm:$0xff] }
 0x205   : > { %2706 = vmatprep.mubr.f32.mxu1 %v7178_v37 }
 0x206   : > { %4454 = vmatpush3.bf16.msra.mxu1 %v4997_v51  ;;  %3656 = vmatmul.mubr.msk.f32.gmra.mrb[50].mxu0 %vm565_vm0, %v3650_v23  ;;  %v3652_v51 = vld [vmem:[%s7093_s1 + $0xa8] sm:$0xff] }
 0x207   : > { %4456 = vmatprep.subr.bf16.mxu1 %v5043_v16  ;;  %2963 = vmatprep.mubr.f32.mxu0 %v7178_v37 }
 0x208   : > { %3639 = vmatmul.mubr.msk.f32.gmra.mrb[88].mxu1 %vm565_vm0, %v6009_v30  ;;  %v3178_v30 = vld [vmem:[%s7096_s4 + $0x28] sm:$0xff] }
 0x209   : > { %2712 = vmatprep.mubr.f32.mxu1 %v7178_v37 }
 0x20a   : > { %4458 = vmatpush3.bf16.msra.mxu1 %v5043_v16  ;;  %3657 = vmatmul.mubr.msk.f32.gmra.mrb[52].mxu0 %vm565_vm0, %v3651_v13  ;;  %v3653_v16 = vld [vmem:[%s7093_s1 + $0xb0] sm:$0xff] }
 0x20b   : > { %4460 = vmatprep.subr.bf16.mxu1 %v7203_v45  ;;  %2969 = vmatprep.mubr.f32.mxu0 %v7178_v37 }
 0x20c   : > { %3640 = vmatmul.mubr.msk.f32.gmra.mrb[90].mxu1 %vm565_vm0, %v6028_v34  ;;  %v3180_v34 = vld [vmem:[%s7096_s4 + $0x38] sm:$0xff] }
 0x20d   : > { %2718 = vmatprep.mubr.f32.mxu1 %v7178_v37 }
 0x20e   : > { %4462 = vmatpush3.bf16.msra.mxu1 %v7203_v45  ;;  %3658 = vmatmul.mubr.msk.f32.gmra.mrb[54].mxu0 %vm565_vm0, %v3652_v51  ;;  %v3654_v45 = vld [vmem:[%s7093_s1 + $0xb8] sm:$0xff] }
 0x20f   : > { %4464 = vmatprep.subr.bf16.mxu1 %v5255_v46  ;;  %2975 = vmatprep.mubr.f32.mxu0 %v7178_v37 }
 0x210   : > { %3641 = vmatmul.mubr.msk.f32.gmra.mrb[92].mxu1 %vm565_vm0, %v6043_v42  ;;  %v4469_v42 = vpack.c.bf16 %v3175_v36, %v3173_v25 }
 0x211   : > { %2724 = vmatprep.mubr.f32.mxu1 %v7178_v37 }
 0x212   : > { %4466 = vmatpush3.bf16.msra.mxu1 %v5255_v46  ;;  %3659 = vmatmul.mubr.msk.f32.gmra.mrb[56].mxu0 %vm565_vm0, %v3653_v16  ;;  %v3174_v46 = vld [vmem:[%s7096_s4 + $0x8] sm:$0xff] }
 0x213   : > { %4096 = vmatprep.subr.mxu1 %v6060_v43  ;;  %2981 = vmatprep.mubr.f32.mxu0 %v7178_v37  ;;  %v4467_v24 = vpack.c.bf16 %v3176_v0, %v3174_v46  ;;  %v3190_v0 = vld [vmem:[%s7096_s4 + $0x88] sm:$0xff] }
 0x214   : > { %3642 = vmatmul.mubr.msk.f32.gmra.mrb[94].mxu1 %vm565_vm0, %v6066_v12  ;;  %v3177_v12 = vld [vmem:[%s7096_s4 + $0x20] sm:$0xff] }
 0x215   : > { %4098 = vmatprep.mubr.msk.f32.mxu1 %vm565_vm0, %v3649_v63  ;;  %4468 = vmatprep.subr.bf16.mxu0 %v4467_v24  ;;  %v4473_v9 = vpack.c.bf16 %v3179_v4, %v3177_v12 }
 0x216   : > { %4097 = vmatpush3.msra.mxu1 %v6060_v43  ;;  %3660 = vmatmul.mubr.msk.f32.gmra.mrb[58].mxu0 %vm565_vm0, %v3654_v45  ;;  %v4471_v43 = vpack.c.bf16 %v3180_v34, %v3178_v30 }
 0x217   : > { %4470 = vmatpush1.bf16.msra.mxu0 %v4469_v42 }
 0x218   : > { %4099 = vmatmul.mubr.msk.f32.vlgmr.msra.gmra.mrb[96].mxu1 %vm565_vm0, %v3650_v23  ;;  %4472 = vmatprep.subr.bf16.mxu0 %v4471_v43  ;;  %v4485_v43 = vpack.c.bf16 %v3191_v17, %v3189_v60 }
 0x219   : > { %4101 = vmatprep.mubr.msk.f32.mxu1 %vm565_vm0, %v3651_v13  ;;  %v4481_v13 = vpack.c.bf16 %v3187_v52, %v3185_v44 }
 0x21b   : > { %4474 = vmatpush1.bf16.msra.mxu0 %v4473_v9 }
 0x21c   : > { %4102 = vmatmul.mubr.msk.f32.gmra.mrb[98].mxu1 %vm565_vm0, %v3652_v51  ;;  %4476 = vmatprep.subr.bf16.mxu0 %v4475_v18 }
 0x21d   : > { %4104 = vmatprep.mubr.msk.f32.mxu1 %vm565_vm0, %v3653_v16 }
 0x21f   : > { %4478 = vmatpush1.bf16.msra.mxu0 %v4477_v26 }
 0x220   : > { %4105 = vmatmul.mubr.msk.f32.gmra.mrb[100].mxu1 %vm565_vm0, %v3654_v45  ;;  %4480 = vmatprep.subr.bf16.mxu0 %v4479_v59  ;;  %vm6455_vm0 = vcmp.eq.s32.totalorder %v1503_v39, 1 }
 0x223   : > { %4482 = vmatpush1.bf16.msra.mxu0 %v4481_v13 }
 0x22a   : > { %v3883_v1 = vpop.f32.mrb[0].mxu0 }
 0x22b   : > { %v1151_v63 = vsel %vm6254_vm13, %v3883_v1, -1e+30  ;;  %v1101_v23 = vpop.f32.mrb[1].mxu0 }
 0x22c   : > { %v6273_v51 = vmax.f32 %v5971_v31, %v1151_v63  ;;  %v1148_v16 = vsel %vm6254_vm13, %v1101_v23, -1e+30 }
 0x22d   : > { %v6285_v46 = vmax.f32 %v5978_v14, %v1148_v16  ;;  %v4483_v14 = vpack.c.bf16 %v3192_v8, %v3190_v0 }
 0x22e   : > { %v1000_v25 = vpop.f32.mrb[18].mxu1  ;;  %v3886_v24 = vpop.f32.mrb[2].mxu0 }
 0x22f   : > { %v1146_v36 = vsel %vm6280_vm14, %v1000_v25, -1e+30  ;;  %v1157_v30 = vsel %vm6254_vm13, %v3886_v24, -1e+30  ;;  %v1002_v34 = vpop.f32.mrb[19].mxu1  ;;  %v1111_v42 = vpop.f32.mrb[3].mxu0  ;;  %4484 = vmatprep.subr.bf16.mxu0 %v4483_v14 }
 0x230   : > { %v6311_v12 = vmax.f32 %v5870_v40, %v1146_v36  ;;  %v6314_v4 = vmax.f32 %v5992_v48, %v1157_v30  ;;  %v1147_v9 = vsel %vm6290_vm15, %v1002_v34, -1e+30  ;;  %v1154_v53 = vsel %vm6254_vm13, %v1111_v42, -1e+30  ;;  %4486 = vmatpush1.bf16.msra.mxu0 %v4485_v43  ;;  %v3194_v40 = vld [vmem:[%s7096_s4 + $0xa8] sm:$0xff]  ;;  %v3196_v48 = vld [vmem:[%s7096_s4 + $0xb8] sm:$0xff] }
 0x231   : > { %v6321_v61 = vmax.f32 %v5874_v62, %v1147_v9  ;;  %v6324_v18 = vmax.f32 %v5996_v7, %v1154_v53  ;;  %v4487_v26 = vpack.c.bf16 %v3196_v48, %v3194_v40  ;;  %v3193_v62 = vld [vmem:[%s7096_s4 + $0xa0] sm:$0xff]  ;;  %v3195_v7 = vld [vmem:[%s7096_s4 + $0xb0] sm:$0xff]  ;;  %v3202_v34 = vld [vmem:[%s7096_s4 + $0xe8] sm:$0xff] }
 0x232   : > { %v1006_v38 = vpop.f32.mrb[20].mxu1  ;;  %v3889_v29 = vpop.f32.mrb[4].mxu0  ;;  %v4489_v44 = vpack.c.bf16 %v3195_v7, %v3193_v62  ;;  %v3197_v24 = vld [vmem:[%s7096_s4 + $0xc0] sm:$0xff]  ;;  %v3204_v42 = vld [vmem:[%s7096_s4 + $0xf8] sm:$0xff]  ;;  %v3206_v62 = vld [vmem:[%s7096_s4 + $0x108] sm:$0xff] }
 0x233   : > { %v1149_v41 = vsel %vm6280_vm14, %v1006_v38, -1e+30  ;;  %v1163_v32 = vsel %vm6254_vm13, %v3889_v29, -1e+30  ;;  %v1008_v1 = vpop.f32.mrb[21].mxu1  ;;  %v1121_v59 = vpop.f32.mrb[5].mxu0  ;;  %4488 = vmatprep.subr.bf16.mxu0 %v4487_v26  ;;  %v4495_v9 = vpack.c.bf16 %v3204_v42, %v3202_v34 }
 0x234   : > { %v6343_v52 = vmax.f32 %v5886_v20, %v1149_v41  ;;  %v6346_v63 = vmax.f32 %v6011_v33, %v1163_v32  ;;  %v1150_v23 = vsel %vm6290_vm15, %v1008_v1, -1e+30  ;;  %v1160_v13 = vsel %vm6254_vm13, %v1121_v59, -1e+30  ;;  %4490 = vmatpush1.bf16.msra.mxu0 %v4489_v44  ;;  %v3198_v20 = vld [vmem:[%s7096_s4 + $0xc8] sm:$0xff]  ;;  %v3200_v33 = vld [vmem:[%s7096_s4 + $0xd8] sm:$0xff] }
 0x235   : > { %v6353_v16 = vmax.f32 %v5890_v54, %v1150_v23  ;;  %v6356_v0 = vmax.f32 %v6015_v55, %v1160_v13  ;;  %v4491_v25 = vpack.c.bf16 %v3200_v33, %v3198_v20  ;;  %v3199_v54 = vld [vmem:[%s7096_s4 + $0xd0] sm:$0xff]  ;;  %v3208_v7 = vld [vmem:[%s7096_s4 + $0x118] sm:$0xff]  ;;  %v3210_v33 = vld [vmem:[%s7096_s4 + $0x128] sm:$0xff] }
 0x236   : > { %v1012_v8 = vpop.f32.mrb[22].mxu1  ;;  %v4493_v60 = vpack.c.bf16 %v3199_v54, %v3197_v24  ;;  %v4499_v32 = vpack.c.bf16 %v3208_v7, %v3206_v62  ;;  %v3214_v42 = vld [vmem:[%s7096_s4 + $0x148] sm:$0xff]  ;;  %v3220_v62 = vld [vmem:[%s7096_s4 + $0x178] sm:$0xff] }
 0x237   : > { %v1152_v55 = vsel %vm6280_vm14, %v1012_v8, -1e+30  ;;  %v1014_v14 = vpop.f32.mrb[23].mxu1  ;;  %4492 = vmatprep.subr.bf16.mxu0 %v4491_v25  ;;  %v3212_v8 = vld [vmem:[%s7096_s4 + $0x138] sm:$0xff] }
 0x238   : > { %v6373_v17 = vmax.f32 %v5902_v27, %v1152_v55  ;;  %v1153_v36 = vsel %vm6290_vm15, %v1014_v14, -1e+30  ;;  %4494 = vmatpush1.bf16.msra.mxu0 %v4493_v60  ;;  %v3201_v27 = vld [vmem:[%s7096_s4 + $0xe0] sm:$0xff]  ;;  %v4503_v24 = vpack.c.bf16 %v3212_v8, %v3210_v33  ;;  %v3223_v33 = vld [vmem:[%s7096_s4 + $0x190] sm:$0xff] }
 0x239   : > { %v6378_v30 = vmax.f32 %v5906_v47, %v1153_v36  ;;  %v3203_v47 = vld [vmem:[%s7096_s4 + $0xf0] sm:$0xff]  ;;  %4496 = vmatprep.subr.bf16.mxu0 %v4495_v9 }
 0x23a   : > { %v1018_v43 = vpop.f32.mrb[24].mxu1  ;;  %v4497_v48 = vpack.c.bf16 %v3203_v47, %v3201_v27  ;;  %v3215_v27 = vld [vmem:[%s7096_s4 + $0x150] sm:$0xff] }
 0x23b   : > { %v1155_v53 = vsel %vm6280_vm14, %v1018_v43, -1e+30  ;;  %v1020_v40 = vpop.f32.mrb[25].mxu1  ;;  %v3216_v43 = vld [vmem:[%s7096_s4 + $0x158] sm:$0xff] }
 0x23c   : > { %v6395_v38 = vmax.f32 %v5918_v56, %v1155_v53  ;;  %v1156_v29 = vsel %vm6290_vm15, %v1020_v40, -1e+30  ;;  %4498 = vmatpush1.bf16.msra.mxu0 %v4497_v48  ;;  %v3205_v56 = vld [vmem:[%s7096_s4 + $0x100] sm:$0xff]  ;;  %v4507_v9 = vpack.c.bf16 %v3216_v43, %v3214_v42  ;;  %v3226_v42 = vld [vmem:[%s7096_s4 + $0x1a8] sm:$0xff] }
 0x23d   : > { %v6400_v26 = vmax.f32 %v5922_v50, %v1156_v29  ;;  %v3207_v50 = vld [vmem:[%s7096_s4 + $0x110] sm:$0xff]  ;;  %4500 = vmatprep.subr.bf16.mxu0 %v4499_v32  ;;  %v3218_v29 = vld [vmem:[%s7096_s4 + $0x168] sm:$0xff] }
 0x23e   : > { %v1024_v41 = vpop.f32.mrb[26].mxu1  ;;  %v4501_v44 = vpack.c.bf16 %v3207_v50, %v3205_v56  ;;  %v4511_v32 = vpack.c.bf16 %v3220_v62, %v3218_v29  ;;  %v3219_v56 = vld [vmem:[%s7096_s4 + $0x170] sm:$0xff]  ;;  %v3222_v50 = vld [vmem:[%s7096_s4 + $0x188] sm:$0xff]  ;;  %v3232_v62 = vld [vmem:[%s7096_s4 + $0x1d8] sm:$0xff] }
 0x23f   : > { %v1158_v1 = vsel %vm6280_vm14, %v1024_v41, -1e+30  ;;  %v1026_v59 = vpop.f32.mrb[27].mxu1  ;;  %v3230_v29 = vld [vmem:[%s7096_s4 + $0x1c8] sm:$0xff] }
 0x240   : > { %v6417_v23 = vmax.f32 %v5935_v35, %v1158_v1  ;;  %v1159_v13 = vsel %vm6290_vm15, %v1026_v59, -1e+30  ;;  %4502 = vmatpush1.bf16.msra.mxu0 %v4501_v44  ;;  %v3209_v35 = vld [vmem:[%s7096_s4 + $0x120] sm:$0xff]  ;;  %v3224_v1 = vld [vmem:[%s7096_s4 + $0x198] sm:$0xff] }
 0x241   : > { %v6422_v20 = vmax.f32 %v5945_v6, %v1159_v13  ;;  %v3211_v6 = vld [vmem:[%s7096_s4 + $0x130] sm:$0xff]  ;;  %4504 = vmatprep.subr.bf16.mxu0 %v4503_v24  ;;  %v4515_v44 = vpack.c.bf16 %v3224_v1, %v3222_v50  ;;  %v3221_v13 = vld [vmem:[%s7096_s4 + $0x180] sm:$0xff] }
 0x242   : > { %v1030_v25 = vpop.f32.mrb[28].mxu1  ;;  %v4505_v14 = vpack.c.bf16 %v3211_v6, %v3209_v35  ;;  %v4517_v35 = vpack.c.bf16 %v3223_v33, %v3221_v13  ;;  %v3234_v13 = vld [vmem:[%s7096_s4 + $0x1e8] sm:$0xff]  ;;  %v3236_v33 = vld [vmem:[%s7096_s4 + $0x1f8] sm:$0xff] }
 0x243   : > { %v1161_v54 = vsel %vm6280_vm14, %v1030_v25, -1e+30  ;;  %v1032_v55 = vpop.f32.mrb[29].mxu1 }
 0x244   : > { %v6439_v60 = vmax.f32 %v5953_v5, %v1161_v54  ;;  %v1162_v36 = vsel %vm6290_vm15, %v1032_v55, -1e+30  ;;  %4506 = vmatpush1.bf16.msra.mxu0 %v4505_v14 }
 0x245   : > { %v6444_v34 = vmax.f32 %v5957_v22, %v1162_v36  ;;  %v3213_v22 = vld [vmem:[%s7096_s4 + $0x140] sm:$0xff]  ;;  %4508 = vmatprep.subr.bf16.mxu0 %v4507_v9 }
 0x246   : > { %v4509_v39 = vpack.c.bf16 %v3215_v27, %v3213_v22  ;;  %v3225_v22 = vld [vmem:[%s7096_s4 + $0x1a0] sm:$0xff]  ;;  %v3227_v27 = vld [vmem:[%s7096_s4 + $0x1b0] sm:$0xff] }
 0x248   : > { %v1369_v53 = vpop.f32.mrb[30].mxu1  ;;  %4510 = vmatpush1.bf16.msra.mxu0 %v4509_v39 }
 0x249   : > { %v1515_v40 = vsel %vm6455_vm0, %v1369_v53, -1e+30  ;;  %v1371_v48 = vpop.f32.mrb[31].mxu1  ;;  %4512 = vmatprep.subr.bf16.mxu0 %v4511_v32  ;;  %v4521_v53 = vpack.c.bf16 %v3227_v27, %v3225_v22  ;;  %v3229_v32 = vld [vmem:[%s7096_s4 + $0x1c0] sm:$0xff] }
 0x24a   : > { %v6484_v7 = vmax.f32 %v6311_v12, %v1515_v40  ;;  %v1516_v41 = vsel %vm6468_vm1, %v1371_v48, -1e+30  ;;  %v4513_v12 = vpack.c.bf16 %v3219_v56, %v3217_v49  ;;  %v3231_v56 = vld [vmem:[%s7096_s4 + $0x1d0] sm:$0xff] }
 0x24b   : > { %v6498_v59 = vmax.f32 %v6321_v61, %v1516_v41  ;;  %v4523_v41 = vpack.c.bf16 %v3232_v62, %v3230_v29  ;;  %v4525_v1 = vpack.c.bf16 %v3231_v56, %v3229_v32  ;;  %v3238_v29 = vld [vmem:[%s7096_s4 + $0x208] sm:$0xff]  ;;  %v3240_v62 = vld [vmem:[%s7096_s4 + $0x218] sm:$0xff] }
 0x24c   : > { %v1375_v8 = vpop.f32.mrb[32].mxu1  ;;  %4514 = vmatpush1.bf16.msra.mxu0 %v4513_v12  ;;  %v4531_v32 = vpack.c.bf16 %v3240_v62, %v3238_v29 }
 0x24d   : > { %v1518_v25 = vsel %vm6455_vm0, %v1375_v8, -1e+30  ;;  %v1377_v24 = vpop.f32.mrb[33].mxu1  ;;  %4516 = vmatprep.subr.bf16.mxu0 %v4515_v44 }
 0x24e   : > { %v6509_v61 = vmax.f32 %v6343_v52, %v1518_v25  ;;  %v1519_v6 = vsel %vm6468_vm1, %v1377_v24, -1e+30  ;;  %v3228_v52 = vld [vmem:[%s7096_s4 + $0x1b8] sm:$0xff]  ;;  %v4527_v25 = vpack.c.bf16 %v3236_v33, %v3234_v13  ;;  %v3233_v24 = vld [vmem:[%s7096_s4 + $0x1e0] sm:$0xff] }
 0x24f   : > { %v6514_v54 = vmax.f32 %v6353_v16, %v1519_v6  ;;  %v4519_v9 = vpack.c.bf16 %v3228_v52, %v3226_v42 }
 0x250   : > { %v1381_v55 = vpop.f32.mrb[34].mxu1  ;;  %4518 = vmatpush1.bf16.msra.mxu0 %v4517_v35  ;;  %v3235_v35 = vld [vmem:[%s7096_s4 + $0x1f0] sm:$0xff] }
 0x251   : > { %v1521_v14 = vsel %vm6455_vm0, %v1381_v55, -1e+30  ;;  %v1383_v36 = vpop.f32.mrb[35].mxu1  ;;  %4520 = vmatprep.subr.bf16.mxu0 %v4519_v9  ;;  %v4529_v55 = vpack.c.bf16 %v3235_v35, %v3233_v24 }
 0x252   : > { %v6525_v43 = vmax.f32 %v6373_v17, %v1521_v14  ;;  %v1522_v16 = vsel %vm6468_vm1, %v1383_v36, -1e+30 }
 0x253   : > { %v6536_v39 = vmax.f32 %v6378_v30, %v1522_v16 }
 0x254   : > { %v1387_v40 = vpop.f32.mrb[36].mxu1  ;;  %4522 = vmatpush1.bf16.msra.mxu0 %v4521_v53 }
 0x255   : > { %v1524_v17 = vsel %vm6455_vm0, %v1387_v40, -1e+30  ;;  %v1389_v48 = vpop.f32.mrb[37].mxu1  ;;  %4524 = vmatprep.subr.bf16.mxu0 %v4523_v41 }
 0x256   : > { %v6547_v49 = vmax.f32 %v6395_v38, %v1524_v17  ;;  %v1525_v30 = vsel %vm6468_vm1, %v1389_v48, -1e+30 }
 0x257   : > { %v6558_v50 = vmax.f32 %v6400_v26, %v1525_v30 }
 0x258   : > { %v1393_v12 = vpop.f32.mrb[38].mxu1  ;;  %4526 = vmatpush1.bf16.msra.mxu0 %v4525_v1 }
 0x259   : > { %v1527_v38 = vsel %vm6455_vm0, %v1393_v12, -1e+30  ;;  %v1395_v44 = vpop.f32.mrb[39].mxu1  ;;  %4528 = vmatprep.subr.bf16.mxu0 %v4527_v25 }
 0x25a   : > { %v6569_v8 = vmax.f32 %v6417_v23, %v1527_v38  ;;  %v1528_v26 = vsel %vm6468_vm1, %v1395_v44, -1e+30 }
 0x25b   : > { %v6580_v6 = vmax.f32 %v6422_v20, %v1528_v26 }
 0x25c   : > { %v1399_v14 = vpop.f32.mrb[40].mxu1  ;;  %4530 = vmatpush1.bf16.msra.mxu0 %v4529_v55 }
 0x25d   : > { %v1530_v23 = vsel %vm6455_vm0, %v1399_v14, -1e+30  ;;  %v1401_v36 = vpop.f32.mrb[41].mxu1  ;;  %4532 = vmatprep.subr.bf16.mxu0 %v4531_v32 }
 0x25e   : > { %v6592_v52 = vmax.f32 %v6439_v60, %v1530_v23  ;;  %v1531_v20 = vsel %vm6468_vm1, %v1401_v36, -1e+30 }
 0x25f   : > { %v6604_v9 = vmax.f32 %v6444_v34, %v1531_v20  ;;  %v3945_v21 = vpop.f32.mrb[6].mxu0 }
 0x260   : > { %v3914_v22 = vpop.f32.mrb[42].mxu1  ;;  %v1889_v27 = vsel %vm6587_vm2, %v3945_v21, -1e+30  ;;  %v1839_v60 = vpop.f32.mrb[7].mxu0 }
 0x261   : > { %v1520_v53 = vsel %vm6599_vm3, %v3914_v22, -1e+30  ;;  %v1470_v40 = vpop.f32.mrb[43].mxu1  ;;  %v1886_v19 = vsel %vm6587_vm2, %v1839_v60, -1e+30 }
 0x262   : > { %v1538_v2 = vmax.f32 %v6273_v51, %v1520_v53  ;;  %v1517_v10 = vsel %vm6599_vm3, %v1470_v40, -1e+30 }
 0x263   : > { %v1535_v34 = vmax.f32 %v6285_v46, %v1517_v10 }
 0x264   : > { %v6616_v17 = vmax.f32 %v1538_v2, %v1889_v27  ;;  %v3917_v48 = vpop.f32.mrb[44].mxu1 }
 0x265   : > { %v6624_v30 = vmax.f32 %v1535_v34, %v1886_v19  ;;  %v1526_v51 = vsel %vm6599_vm3, %v3917_v48, -1e+30  ;;  %v1480_v41 = vpop.f32.mrb[45].mxu1 }
 0x266   : > { %v1544_v46 = vmax.f32 %v6314_v4, %v1526_v51  ;;  %v1523_v56 = vsel %vm6599_vm3, %v1480_v41, -1e+30  ;;  %v3948_v1 = vpop.f32.mrb[8].mxu0 }
 0x267   : > { %v1541_v12 = vmax.f32 %v6324_v18, %v1523_v56  ;;  %v1895_v38 = vsel %vm6587_vm2, %v3948_v1, -1e+30  ;;  %v1849_v44 = vpop.f32.mrb[9].mxu0 }
 0x268   : > { %v6634_v13 = vmax.f32 %v1544_v46, %v1895_v38  ;;  %v1892_v33 = vsel %vm6587_vm2, %v1849_v44, -1e+30  ;;  %v3920_v26 = vpop.f32.mrb[46].mxu1 }
 0x269   : > { %v6638_v25 = vmax.f32 %v1541_v12, %v1892_v33  ;;  %v1532_v4 = vsel %vm6599_vm3, %v3920_v26, -1e+30  ;;  %v1490_v24 = vpop.f32.mrb[47].mxu1 }
 0x26a   : > { %v1550_v35 = vmax.f32 %v6346_v63, %v1532_v4  ;;  %v1529_v18 = vsel %vm6599_vm3, %v1490_v24, -1e+30  ;;  %v3951_v55 = vpop.f32.mrb[10].mxu0 }
 0x26b   : > { %v1547_v14 = vmax.f32 %v6356_v0, %v1529_v18  ;;  %v1901_v23 = vsel %vm6587_vm2, %v3951_v55, -1e+30  ;;  %v1859_v36 = vpop.f32.mrb[11].mxu0 }
 0x26c   : > { %v6648_v20 = vmax.f32 %v1550_v35, %v1901_v23  ;;  %v1898_v21 = vsel %vm6587_vm2, %v1859_v36, -1e+30 }
 0x26d   : > { %v6652_v22 = vmax.f32 %v1547_v14, %v1898_v21 }
 0x275   : > { %v6668_v27 = vpop.f32.mrb[12].mxu0 }
 0x276   : > { %v1738_v42 = vpop.f32.mrb[48].mxu1  ;;  %v6670_v60 = vpop.f32.mrb[13].mxu0 }
 0x277   : > { %v1884_v53 = vsel %vm6657_vm4, %v1738_v42, -1e+30  ;;  %v1740_v28 = vpop.f32.mrb[49].mxu1 }
 0x278   : > { %v6675_v57 = vmax.f32 %v6484_v7, %v1884_v53  ;;  %v1885_v40 = vsel %vm6664_vm5, %v1740_v28, -1e+30 }
 0x279   : > { %v6680_v11 = vmax.f32 %v6498_v59, %v1885_v40 }
 0x27a   : > { %v2141_v3 = vmax.f32 %v6675_v57, %v6668_v27  ;;  %v1744_v15 = vpop.f32.mrb[50].mxu1 }
 0x27b   : > { %v1887_v19 = vsel %vm6657_vm4, %v1744_v15, -1e+30  ;;  %v2142_v2 = vmax.f32 %v6680_v11, %v6670_v60  ;;  %v1746_v10 = vpop.f32.mrb[51].mxu1  ;;  %v6688_v34 = vpop.f32.mrb[14].mxu0 }
 0x27c   : > { %v6691_v7 = vmax.f32 %v6509_v61, %v1887_v19  ;;  %v1888_v59 = vsel %vm6664_vm5, %v1746_v10, -1e+30  ;;  %v6695_v48 = vpop.f32.mrb[15].mxu0 }
 0x27d   : > { %v6698_v29 = vmax.f32 %v6514_v54, %v1888_v59 }
 0x27e   : > { %v2144_v62 = vmax.f32 %v6691_v7, %v6688_v34  ;;  %v1750_v51 = vpop.f32.mrb[52].mxu1 }
 0x27f   : > { %v1890_v41 = vsel %vm6657_vm4, %v1750_v51, -1e+30  ;;  %v2145_v32 = vmax.f32 %v6698_v29, %v6695_v48  ;;  %v1752_v61 = vpop.f32.mrb[53].mxu1  ;;  %v6706_v46 = vpop.f32.mrb[16].mxu0 }
 0x280   : > { %v6709_v56 = vmax.f32 %v6525_v43, %v1890_v41  ;;  %v1891_v54 = vsel %vm6664_vm5, %v1752_v61, -1e+30  ;;  %v6713_v1 = vpop.f32.mrb[17].mxu0 }
 0x281   : > { %v6716_v12 = vmax.f32 %v6536_v39, %v1891_v54 }
 0x282   : > { %v2147_v38 = vmax.f32 %v6709_v56, %v6706_v46  ;;  %v1756_v44 = vpop.f32.mrb[54].mxu1 }
 0x283   : > { %v1893_v33 = vsel %vm6657_vm4, %v1756_v44, -1e+30  ;;  %v2148_v26 = vmax.f32 %v6716_v12, %v6713_v1  ;;  %v1758_v43 = vpop.f32.mrb[55].mxu1  ;;  %v6724_v4 = vpop.f32.mrb[18].mxu0 }
 0x284   : > { %v6727_v24 = vmax.f32 %v6547_v49, %v1893_v33  ;;  %v1894_v39 = vsel %vm6664_vm5, %v1758_v43, -1e+30  ;;  %v6731_v35 = vpop.f32.mrb[19].mxu0 }
 0x285   : > { %v6734_v18 = vmax.f32 %v6558_v50, %v1894_v39 }
 0x286   : > { %v2150_v55 = vmax.f32 %v6727_v24, %v6724_v4  ;;  %v1762_v14 = vpop.f32.mrb[56].mxu1 }
 0x287   : > { %v1896_v23 = vsel %vm6657_vm4, %v1762_v14, -1e+30  ;;  %v2151_v36 = vmax.f32 %v6734_v18, %v6731_v35  ;;  %v1764_v49 = vpop.f32.mrb[57].mxu1  ;;  %v6742_v21 = vpop.f32.mrb[20].mxu0 }
 0x288   : > { %v6745_v42 = vmax.f32 %v6569_v8, %v1896_v23  ;;  %v1897_v50 = vsel %vm6664_vm5, %v1764_v49, -1e+30  ;;  %v6749_v53 = vpop.f32.mrb[21].mxu0 }
 0x289   : > { %v6752_v28 = vmax.f32 %v6580_v6, %v1897_v50 }
 0x28a   : > { %v2153_v40 = vmax.f32 %v6745_v42, %v6742_v21  ;;  %v1768_v15 = vpop.f32.mrb[58].mxu1 }
 0x28b   : > { %v1899_v19 = vsel %vm6657_vm4, %v1768_v15, -1e+30  ;;  %v2154_v10 = vmax.f32 %v6752_v28, %v6749_v53  ;;  %v1770_v8 = vpop.f32.mrb[59].mxu1  ;;  %v6760_v59 = vpop.f32.mrb[22].mxu0 }
 0x28c   : > { %v6763_v51 = vmax.f32 %v6592_v52, %v1899_v19  ;;  %v1900_v6 = vsel %vm6664_vm5, %v1770_v8, -1e+30  ;;  %v6767_v41 = vpop.f32.mrb[23].mxu0 }
 0x28d   : > { %v6770_v61 = vmax.f32 %v6604_v9, %v1900_v6 }
 0x28e   : > { %v2156_v63 = vmax.f32 %v6763_v51, %v6760_v59  ;;  %v3976_v54 = vpop.f32.mrb[60].mxu1 }
 0x28f   : > { %v2157_v44 = vmax.f32 %v6770_v61, %v6767_v41  ;;  %v2146_v33 = vmax.f32 %v6616_v17, %v3976_v54  ;;  %v2112_v43 = vpop.f32.mrb[61].mxu1  ;;  %v4007_v52 = vpop.f32.mrb[24].mxu0 }
 0x290   : > { %v2143_v39 = vmax.f32 %v6624_v30, %v2112_v43  ;;  %v2360_v0 = vsel %vm6599_vm3, %v4007_v52, -1e+30  ;;  %v2326_v14 = vpop.f32.mrb[25].mxu0 }
 0x291   : > { %v6780_v23 = vmax.f32 %v2146_v33, %v2360_v0  ;;  %v2357_v9 = vsel %vm6599_vm3, %v2326_v14, -1e+30 }
 0x292   : > { %v6784_v49 = vmax.f32 %v2143_v39, %v2357_v9  ;;  %v3979_v50 = vpop.f32.mrb[62].mxu1 }
 0x293   : > { %v2152_v15 = vmax.f32 %v6634_v13, %v3979_v50  ;;  %v2122_v19 = vpop.f32.mrb[63].mxu1  ;;  %v4010_v17 = vpop.f32.mrb[26].mxu0 }
 0x294   : > { %v2149_v8 = vmax.f32 %v6638_v25, %v2122_v19  ;;  %v2366_v30 = vsel %vm6599_vm3, %v4010_v17, -1e+30  ;;  %v2336_v6 = vpop.f32.mrb[27].mxu0 }
 0x295   : > { %v6790_v54 = vmax.f32 %v2152_v15, %v2366_v30  ;;  %v2363_v33 = vsel %vm6599_vm3, %v2336_v6, -1e+30 }
 0x296   : > { %v6794_v43 = vmax.f32 %v2149_v8, %v2363_v33  ;;  %v3982_v52 = vpop.f32.mrb[64].mxu1 }
 0x297   : > { %v2158_v39 = vmax.f32 %v6648_v20, %v3982_v52  ;;  %v2132_v0 = vpop.f32.mrb[65].mxu1  ;;  %v4013_v13 = vpop.f32.mrb[28].mxu0 }
 0x298   : > { %v2155_v14 = vmax.f32 %v6652_v22, %v2132_v0  ;;  %v2372_v25 = vsel %vm6599_vm3, %v4013_v13, -1e+30  ;;  %v2346_v9 = vpop.f32.mrb[29].mxu0 }
 0x299   : > { %v6800_v50 = vmax.f32 %v2158_v39, %v2372_v25  ;;  %v2369_v15 = vsel %vm6599_vm3, %v2346_v9, -1e+30 }
 0x29a   : > { %v6804_v19 = vmax.f32 %v2155_v14, %v2369_v15 }
 0x2a4   : > { %v2225_v17 = vpop.f32.mrb[66].mxu1 }
 0x2a5   : > { %v2355_v8 = vsel %vm6455_vm0, %v2225_v17, -1e+30  ;;  %v2227_v20 = vpop.f32.mrb[67].mxu1  ;;  %v6808_v30 = vpop.f32.mrb[30].mxu0 }
 0x2a6   : > { %v6813_v22 = vmax.f32 %v2141_v3, %v2355_v8  ;;  %v2356_v6 = vsel %vm6468_vm1, %v2227_v20, -1e+30  ;;  %v6817_v33 = vpop.f32.mrb[31].mxu0 }
 0x2a7   : > { %v6822_v16 = vmax.f32 %v2142_v2, %v2356_v6 }
 0x2a8   : > { %v2612_v52 = vmax.f32 %v6813_v22, %v6808_v30  ;;  %v3237_v30 = vld [vmem:[%s7096_s4 + $0x200] sm:$0xff]  ;;  %v3239_v22 = vld [vmem:[%s7096_s4 + $0x210] sm:$0xff] }
 0x2a9   : > { %v2231_v39 = vpop.f32.mrb[68].mxu1  ;;  %v2613_v0 = vmax.f32 %v6822_v16, %v6817_v33 }
 0x2aa   : > { %v2358_v27 = vsel %vm6455_vm0, %v2231_v39, -1e+30  ;;  %v2233_v57 = vpop.f32.mrb[69].mxu1  ;;  %v6830_v3 = vpop.f32.mrb[32].mxu0 }
 0x2ab   : > { %v6835_v13 = vmax.f32 %v2144_v62, %v2358_v27  ;;  %v2359_v60 = vsel %vm6468_vm1, %v2233_v57, -1e+30  ;;  %v6839_v11 = vpop.f32.mrb[33].mxu0 }
 0x2ac   : > { %v6844_v2 = vmax.f32 %v2145_v32, %v2359_v60 }
 0x2ad   : > { %v2615_v14 = vmax.f32 %v6835_v13, %v6830_v3  ;;  %v2237_v25 = vpop.f32.mrb[70].mxu1 }
 0x2ae   : > { %v2361_v9 = vsel %vm6455_vm0, %v2237_v25, -1e+30  ;;  %v2616_v34 = vmax.f32 %v6844_v2, %v6839_v11  ;;  %v2239_v7 = vpop.f32.mrb[71].mxu1  ;;  %v6852_v62 = vpop.f32.mrb[34].mxu0 }
 0x2af   : > { %v6857_v15 = vmax.f32 %v2147_v38, %v2361_v9  ;;  %v2362_v48 = vsel %vm6468_vm1, %v2239_v7, -1e+30  ;;  %v6861_v29 = vpop.f32.mrb[35].mxu0 }
 0x2b0   : > { %v6866_v32 = vmax.f32 %v2148_v26, %v2362_v48 }
 0x2b1   : > { %v2618_v17 = vmax.f32 %v6857_v15, %v6852_v62  ;;  %v2243_v8 = vpop.f32.mrb[72].mxu1 }
 0x2b2   : > { %v2364_v20 = vsel %vm6455_vm0, %v2243_v8, -1e+30  ;;  %v2619_v46 = vmax.f32 %v6866_v32, %v6861_v29  ;;  %v2245_v56 = vpop.f32.mrb[73].mxu1  ;;  %v6874_v38 = vpop.f32.mrb[36].mxu0 }
 0x2b3   : > { %v6879_v6 = vmax.f32 %v2150_v55, %v2364_v20  ;;  %v2365_v1 = vsel %vm6468_vm1, %v2245_v56, -1e+30  ;;  %v6883_v12 = vpop.f32.mrb[37].mxu0 }
 0x2b4   : > { %v6888_v26 = vmax.f32 %v2151_v36, %v2365_v1 }
 0x2b5   : > { %v2621_v39 = vmax.f32 %v6879_v6, %v6874_v38  ;;  %v2249_v27 = vpop.f32.mrb[74].mxu1 }
 0x2b6   : > { %v2367_v57 = vsel %vm6455_vm0, %v2249_v27, -1e+30  ;;  %v2622_v4 = vmax.f32 %v6888_v26, %v6883_v12  ;;  %v2251_v24 = vpop.f32.mrb[75].mxu1  ;;  %v6896_v55 = vpop.f32.mrb[38].mxu0 }
 0x2b7   : > { %v6901_v60 = vmax.f32 %v2153_v40, %v2367_v57  ;;  %v2368_v35 = vsel %vm6468_vm1, %v2251_v24, -1e+30  ;;  %v6905_v18 = vpop.f32.mrb[39].mxu0 }
 0x2b8   : > { %v6910_v36 = vmax.f32 %v2154_v10, %v2368_v35 }
 0x2b9   : > { %v2624_v25 = vmax.f32 %v6901_v60, %v6896_v55  ;;  %v2255_v9 = vpop.f32.mrb[76].mxu1 }
 0x2ba   : > { %v2370_v7 = vsel %vm6455_vm0, %v2255_v9, -1e+30  ;;  %v2625_v21 = vmax.f32 %v6910_v36, %v6905_v18  ;;  %v2257_v42 = vpop.f32.mrb[77].mxu1  ;;  %v6918_v40 = vpop.f32.mrb[40].mxu0 }
 0x2bb   : > { %v6923_v48 = vmax.f32 %v2156_v63, %v2370_v7  ;;  %v2371_v53 = vsel %vm6468_vm1, %v2257_v42, -1e+30  ;;  %v6927_v28 = vpop.f32.mrb[41].mxu0 }
 0x2bc   : > { %v6932_v5 = vmax.f32 %v2157_v44, %v2371_v53 }
 0x2bd   : > { %v2627_v10 = vmax.f32 %v6923_v48, %v6918_v40  ;;  %v4038_v8 = vpop.f32.mrb[78].mxu1 }
 0x2be   : > { %v2628_v20 = vmax.f32 %v6932_v5, %v6927_v28  ;;  %v2617_v59 = vmax.f32 %v6780_v23, %v4038_v8  ;;  %v2583_v51 = vpop.f32.mrb[79].mxu1  ;;  %v4069_v63 = vpop.f32.mrb[42].mxu0 }
 0x2bf   : > { %v2614_v47 = vmax.f32 %v6784_v49, %v2583_v51  ;;  %v2831_v56 = vsel %vm6254_vm13, %v4069_v63, -1e+30  ;;  %v2797_v1 = vpop.f32.mrb[43].mxu0 }
 0x2c0   : > { %v6942_v41 = vmax.f32 %v2617_v59, %v2831_v56  ;;  %v2828_v61 = vsel %vm6254_vm13, %v2797_v1, -1e+30 }
 0x2c1   : > { %v6946_v44 = vmax.f32 %v2614_v47, %v2828_v61  ;;  %v4041_v27 = vpop.f32.mrb[80].mxu1 }
 0x2c2   : > { %v2623_v57 = vmax.f32 %v6790_v54, %v4041_v27  ;;  %v2593_v24 = vpop.f32.mrb[81].mxu1  ;;  %v4072_v23 = vpop.f32.mrb[44].mxu0 }
 0x2c3   : > { %v2620_v35 = vmax.f32 %v6794_v43, %v2593_v24  ;;  %v2837_v49 = vsel %vm6254_vm13, %v4072_v23, -1e+30  ;;  %v2807_v9 = vpop.f32.mrb[45].mxu0 }
 0x2c4   : > { %v6952_v7 = vmax.f32 %v2623_v57, %v2837_v49  ;;  %v2834_v42 = vsel %vm6254_vm13, %v2807_v9, -1e+30 }
 0x2c5   : > { %v6956_v53 = vmax.f32 %v2620_v35, %v2834_v42  ;;  %v4044_v8 = vpop.f32.mrb[82].mxu1  ;;  %v6978_v42 = vpop.permute.xlu1 %3109 }
 0x2c6   : > { %v2629_v59 = vmax.f32 %v6800_v50, %v4044_v8  ;;  %v2603_v51 = vpop.f32.mrb[83].mxu1  ;;  %v4075_v54 = vpop.f32.mrb[46].mxu0 }
 0x2c7   : > { %v2626_v63 = vmax.f32 %v6804_v19, %v2603_v51  ;;  %v2843_v43 = vsel %vm6254_vm13, %v4075_v54, -1e+30  ;;  %v2817_v47 = vpop.f32.mrb[47].mxu0  ;;  %v3242_v54 = vld [vmem:[%s7096_s4 + $0x228] sm:$0xff] }
 0x2c8   : > { %v6962_v56 = vmax.f32 %v2629_v59, %v2843_v43  ;;  %v2840_v1 = vsel %vm6254_vm13, %v2817_v47, -1e+30 }
 0x2c9   : > { %v6966_v61 = vmax.f32 %v2626_v63, %v2840_v1  ;;  %v3244_v63 = vld [vmem:[%s7096_s4 + $0x238] sm:$0xff]  ;;  %v4533_v1 = vpack.c.bf16 %v3239_v22, %v3237_v30 }
 0x2d3   : > { %v2696_v27 = vpop.f32.mrb[84].mxu1 }
 0x2d4   : > { %v2826_v57 = vsel %vm6280_vm14, %v2696_v27, -1e+30  ;;  %v2698_v50 = vpop.f32.mrb[85].mxu1 }
 0x2d5   : > { %v2844_v19 = vmax.f32 %v2612_v52, %v2826_v57  ;;  %v2827_v24 = vsel %vm6290_vm15, %v2698_v50, -1e+30  ;;  %v2953_v23 = vpop.f32.mrb[48].mxu0 }
 0x2d6   : > { %v2845_v58 = vmax.f32 %v2613_v0, %v2827_v24  ;;  %v2955_v35 = vpop.f32.mrb[49].mxu0 }
 0x2d7   : > { %v3083_v49 = vmax.f32 %v2844_v19, %v2953_v23  ;;  %v2702_v9 = vpop.f32.mrb[86].mxu1  ;;  %v7006_v19 = vpop.permute.xlu0 %3114  ;;  %v4535_v23 = vpack.c.bf16 %v3244_v63, %v3242_v54 }
 0x2d8   : > { %v2829_v8 = vsel %vm6280_vm14, %v2702_v9, -1e+30  ;;  %v3084_v59 = vmax.f32 %v2845_v58, %v2955_v35  ;;  %v2704_v51 = vpop.f32.mrb[87].mxu1  ;;  %v3243_v9 = vld [vmem:[%s7096_s4 + $0x230] sm:$0xff] }
 0x2d9   : > { %v3137_v33 = vadd.f32 %v6978_v42, %v3083_v49  ;;  %v2847_v16 = vmax.f32 %v2615_v14, %v2829_v8  ;;  %v2830_v52 = vsel %vm6290_vm15, %v2704_v51, -1e+30  ;;  %v2959_v0 = vpop.f32.mrb[50].mxu0  ;;  %v3241_v49 = vld [vmem:[%s7096_s4 + $0x220] sm:$0xff]  ;;  %v7020_v8 = vpop.permute.xlu1 %3119 }
 0x2da   : > { %v3138_v43 = vadd.f32 %v6978_v42, %v3084_v59  ;;  %v2848_v47 = vmax.f32 %v2616_v34, %v2830_v52  ;;  %v2961_v3 = vpop.f32.mrb[51].mxu0  ;;  %v4537_v52 = vpack.c.bf16 %v3243_v9, %v3241_v49 }
 0x2db   : > { %v3086_v13 = vmax.f32 %v2847_v16, %v2959_v0  ;;  %v2708_v14 = vpop.f32.mrb[88].mxu1  ;;  %v3155_v58 = vmax.f32 %v3137_v33, 0.0 }
 0x2dc   : > { %v3156_v27 = vmax.f32 %v3138_v43, 0.0  ;;  %v2832_v57 = vsel %vm6280_vm14, %v2708_v14, -1e+30  ;;  %v3087_v50 = vmax.f32 %v2848_v47, %v2961_v3  ;;  %v2710_v24 = vpop.f32.mrb[89].mxu1 }
 0x2dd   : > { %v2850_v35 = vmax.f32 %v2618_v17, %v2832_v57  ;;  %v3140_v11 = vadd.f32 %v7006_v19, %v3086_v13  ;;  %v2833_v2 = vsel %vm6290_vm15, %v2710_v24, -1e+30  ;;  %v2965_v34 = vpop.f32.mrb[52].mxu0  ;;  %v7038_v14 = vpop.permute.xlu1 %3124 }
 0x2de   : > { %v3141_v59 = vadd.f32 %v7006_v19, %v3087_v50  ;;  %v2851_v62 = vmax.f32 %v2619_v46, %v2833_v2  ;;  %3328 = vmatprep.mubr.f32.mxu0 %v3156_v27  ;;  %v2967_v15 = vpop.f32.mrb[53].mxu0 }
 0x2df   : > { %v3089_v17 = vmax.f32 %v2850_v35, %v2965_v34  ;;  %v2714_v51 = vpop.f32.mrb[90].mxu1  ;;  %3329 = vmatmul.mubr.f32.vlgmr.msra.gmra.mrb[60].mxu0 %v3155_v58  ;;  %v3158_v54 = vmax.f32 %v3140_v11, 0.0  ;;  %v3130_v11 = vpop.permute.xlu0 %3129 }
 0x2e0   : > { %v2835_v30 = vsel %vm6280_vm14, %v2714_v51, -1e+30  ;;  %v3090_v22 = vmax.f32 %v2851_v62, %v2967_v15  ;;  %v2716_v33 = vpop.f32.mrb[91].mxu1  ;;  %v3159_v16 = vmax.f32 %v3141_v59, 0.0  ;;  %4534 = vmatpush1.bf16.msra.mxu0 %v4533_v1 }
 0x2e1   : > { %v3143_v0 = vadd.f32 %v7020_v8, %v3089_v17  ;;  %v2853_v29 = vmax.f32 %v2621_v39, %v2835_v30  ;;  %v2836_v32 = vsel %vm6290_vm15, %v2716_v33, -1e+30  ;;  %v2971_v46 = vpop.f32.mrb[54].mxu0  ;;  %4536 = vmatprep.subr.bf16.mxu0 %v4535_v23  ;;  %v3135_v17 = vpop.permute.xlu1 %3134 }
 0x2e2   : > { %v3144_v63 = vadd.f32 %v7020_v8, %v3090_v22  ;;  %v2854_v43 = vmax.f32 %v2622_v4, %v2836_v32  ;;  %3334 = vmatprep.mubr.f32.mxu0 %v3159_v16  ;;  %v2973_v47 = vpop.f32.mrb[55].mxu0 }
 0x2e3   : > { %v3092_v3 = vmax.f32 %v2853_v29, %v2971_v46  ;;  %v2720_v13 = vpop.f32.mrb[92].mxu1  ;;  %3335 = vmatmul.mubr.f32.gmra.mrb[62].mxu0 %v3158_v54  ;;  %v3161_v27 = vmax.f32 %v3143_v0, 0.0 }
 0x2e4   : > { %v3162_v38 = vmax.f32 %v3144_v63, 0.0  ;;  %v2838_v6 = vsel %vm6280_vm14, %v2720_v13, -1e+30  ;;  %v3093_v39 = vmax.f32 %v2854_v43, %v2973_v47  ;;  %v2722_v1 = vpop.f32.mrb[93].mxu1  ;;  %4538 = vmatpush1.bf16.msra.mxu0 %v4537_v52 }
 0x2e5   : > { %v3146_v57 = vadd.f32 %v7038_v14, %v3092_v3  ;;  %v2856_v12 = vmax.f32 %v2624_v25, %v2838_v6  ;;  %v2839_v26 = vsel %vm6290_vm15, %v2722_v1, -1e+30  ;;  %v2977_v4 = vpop.f32.mrb[56].mxu0 }
 0x2e6   : > { %v3147_v50 = vadd.f32 %v7038_v14, %v3093_v39  ;;  %v2857_v24 = vmax.f32 %v2625_v21, %v2839_v26  ;;  %3340 = vmatprep.mubr.f32.mxu0 %v3162_v38  ;;  %v2979_v23 = vpop.f32.mrb[57].mxu0 }
 0x2e7   : > { %v3095_v58 = vmax.f32 %v2856_v12, %v2977_v4  ;;  %v2726_v35 = vpop.f32.mrb[94].mxu1  ;;  %3341 = vmatmul.mubr.f32.gmra.mrb[64].mxu0 %v3161_v27  ;;  %v3164_v34 = vmax.f32 %v3146_v57, 0.0 }
 0x2e8   : > { %v3165_v2 = vmax.f32 %v3147_v50, 0.0  ;;  %v2841_v55 = vsel %vm6280_vm14, %v2726_v35, -1e+30  ;;  %v3096_v60 = vmax.f32 %v2857_v24, %v2979_v23  ;;  %v2728_v25 = vpop.f32.mrb[95].mxu1 }
 0x2e9   : > { %v3149_v49 = vadd.f32 %v3130_v11, %v3095_v58  ;;  %v2859_v9 = vmax.f32 %v2627_v10, %v2841_v55  ;;  %v2842_v18 = vsel %vm6290_vm15, %v2728_v25, -1e+30  ;;  %v2983_v36 = vpop.f32.mrb[58].mxu0 }
 0x2ea   : > { %v3150_v21 = vadd.f32 %v3130_v11, %v3096_v60  ;;  %v2860_v59 = vmax.f32 %v2628_v20, %v2842_v18  ;;  %3346 = vmatprep.mubr.f32.mxu0 %v3165_v2  ;;  %v2985_v45 = vpop.f32.mrb[59].mxu0 }
 0x2eb   : > { %v3098_v62 = vmax.f32 %v2859_v9, %v2983_v36  ;;  %v4100_v15 = vpop.f32.mrb[96].mxu1  ;;  %3347 = vmatmul.mubr.f32.gmra.mrb[66].mxu0 %v3164_v34  ;;  %v3167_v10 = vmax.f32 %v3149_v49, 0.0 }
 0x2ec   : > { %v3168_v51 = vmax.f32 %v3150_v21, 0.0  ;;  %v3099_v30 = vmax.f32 %v2860_v59, %v2985_v45  ;;  %v3088_v40 = vmax.f32 %v6942_v41, %v4100_v15  ;;  %v3054_v48 = vpop.f32.mrb[97].mxu1 }
 0x2ed   : > { %v3152_v31 = vadd.f32 %v3135_v17, %v3098_v62  ;;  %v3085_v22 = vmax.f32 %v6946_v44, %v3054_v48 }
 0x2ee   : > { %v3153_v33 = vadd.f32 %v3135_v17, %v3099_v30  ;;  %3352 = vmatprep.mubr.f32.mxu0 %v3168_v51  ;;  %v3142_v44 = vadd.f32 %v7006_v19, %v3088_v40 }
 0x2ef   : > { %v4103_v16 = vpop.f32.mrb[98].mxu1  ;;  %3353 = vmatmul.mubr.f32.gmra.mrb[68].mxu0 %v3167_v10  ;;  %v3170_v52 = vmax.f32 %v3152_v31, 0.0  ;;  %v3139_v0 = vadd.f32 %v6978_v42, %v3085_v22 }
 0x2f0   : > { %v3171_v28 = vmax.f32 %v3153_v33, 0.0  ;;  %v3094_v5 = vmax.f32 %v6952_v7, %v4103_v16  ;;  %v3064_v20 = vpop.f32.mrb[99].mxu1  ;;  %v3160_v42 = vmax.f32 %v3142_v44, 0.0 }
 0x2f1   : > { %v3091_v29 = vmax.f32 %v6956_v53, %v3064_v20  ;;  %v3157_v54 = vmax.f32 %v3139_v0, 0.0 }
 0x2f2   : > { %3358 = vmatprep.mubr.f32.mxu0 %v3171_v28 }
 0x2f3   : > { %v4106_v41 = vpop.f32.mrb[100].mxu1  ;;  %3359 = vmatmul.mubr.f32.gmra.mrb[70].mxu0 %v3170_v52  ;;  %v3145_v53 = vadd.f32 %v7020_v8, %v3091_v29 }
 0x2f4   : > { %v3100_v32 = vmax.f32 %v6962_v56, %v4106_v41  ;;  %v3074_v46 = vpop.f32.mrb[101].mxu1  ;;  %3429 = vmatprep.mubr.f32.mxu0 %v7178_v37  ;;  %v3148_v56 = vadd.f32 %v7038_v14, %v3094_v5 }
 0x2f5   : > { %v3097_v7 = vmax.f32 %v6966_v61, %v3074_v46  ;;  %v3163_v63 = vmax.f32 %v3145_v53, 0.0 }
 0x2f6   : > { %v3166_v61 = vmax.f32 %v3148_v56, 0.0  ;;  %v3154_v43 = vadd.f32 %v3135_v17, %v3100_v32 }
 0x2f7   : > { %3667 = vmatmul.mubr.msk.f32.vlgmr.msra.gmra.mrb[60].mxu0 %vm3245_vm6, %v3157_v54  ;;  %v3151_v19 = vadd.f32 %v3130_v11, %v3097_v7 }
 0x2f8   : > { %3435 = vmatprep.mubr.f32.mxu0 %v7178_v37  ;;  %v3172_v47 = vmax.f32 %v3154_v43, 0.0 }
 0x2f9   : > { %v3169_v8 = vmax.f32 %v3151_v19, 0.0 }
 0x2fb   : > { %3668 = vmatmul.mubr.msk.f32.gmra.mrb[62].mxu0 %vm3245_vm6, %v3160_v42 }
 0x2fc   : > { %3441 = vmatprep.mubr.f32.mxu0 %v7178_v37 }
 0x2ff   : > { %3669 = vmatmul.mubr.msk.f32.gmra.mrb[64].mxu0 %vm3245_vm6, %v3163_v63 }
 0x300   : > { %3447 = vmatprep.mubr.f32.mxu0 %v7178_v37 }
 0x303   : > { %3670 = vmatmul.mubr.msk.f32.gmra.mrb[66].mxu0 %vm3245_vm6, %v3166_v61 }
 0x304   : > { %3453 = vmatprep.mubr.f32.mxu0 %v7178_v37 }
 0x307   : > { %3671 = vmatmul.mubr.msk.f32.gmra.mrb[68].mxu0 %vm3245_vm6, %v3169_v8 }
 0x308   : > { %3459 = vmatprep.mubr.f32.mxu0 %v7178_v37 }
 0x30b   : > { %3672 = vmatmul.mubr.msk.f32.gmra.mrb[70].mxu0 %vm3245_vm6, %v3172_v47 }
 0x3ca   : > { %v3431_v3 = vpop.f32.mrb[60].mxu0 }
 0x3cb   : > { %3466 = vst [vmem:[%s224_s24] sm:$0xff] %v3431_v3  ;;  %v3433_v13 = vpop.f32.mrb[61].mxu0 }
 0x3cc   : > { %3467 = vst [vmem:[%s224_s24 + $0x8] sm:$0xff] %v3433_v13 }
 0x3ce   : > { %v3437_v14 = vpop.f32.mrb[62].mxu0 }
 0x3cf   : > { %3468 = vst [vmem:[%s224_s24 + $0x10] sm:$0xff] %v3437_v14  ;;  %v3439_v38 = vpop.f32.mrb[63].mxu0 }
 0x3d0   : > { %3469 = vst [vmem:[%s224_s24 + $0x18] sm:$0xff] %v3439_v38 }
 0x3d2   : > { %v3443_v6 = vpop.f32.mrb[64].mxu0 }
 0x3d3   : > { %3470 = vst [vmem:[%s224_s24 + $0x20] sm:$0xff] %v3443_v6  ;;  %v3445_v39 = vpop.f32.mrb[65].mxu0 }
 0x3d4   : > { %3471 = vst [vmem:[%s224_s24 + $0x28] sm:$0xff] %v3445_v39 }
 0x3d6   : > { %v3449_v37 = vpop.f32.mrb[66].mxu0 }
 0x3d7   : > { %3472 = vst [vmem:[%s224_s24 + $0x30] sm:$0xff] %v3449_v37  ;;  %v3451_v1 = vpop.f32.mrb[67].mxu0 }
 0x3d8   : > { %3473 = vst [vmem:[%s224_s24 + $0x38] sm:$0xff] %v3451_v1 }
 0x3da   : > { %v3455_v27 = vpop.f32.mrb[68].mxu0 }
 0x3db   : > { %3474 = vst [vmem:[%s224_s24 + $0x40] sm:$0xff] %v3455_v27  ;;  %v3457_v57 = vpop.f32.mrb[69].mxu0 }
 0x3dc   : > { %3475 = vst [vmem:[%s224_s24 + $0x48] sm:$0xff] %v3457_v57 }
 0x3de   : > { %v3461_v12 = vpop.f32.mrb[70].mxu0 }
 0x3df   : > { %3476 = vst [vmem:[%s224_s24 + $0x50] sm:$0xff] %v3461_v12  ;;  %v3463_v26 = vpop.f32.mrb[71].mxu0 }
 0x3e0   : > { %3477 = vst [vmem:[%s224_s24 + $0x58] sm:$0xff] %v3463_v26 }
 0x3e1 PF: > { %s15_s18 = sadd.s32 1, %s4807_s18  }
 0x3e2   : > { %p12_p4 = scmp.ge.s32.totalorder %s15_s18, 4  }
 0x3e4   :  { %14 = sbr.rel (!%p12_p4) target bundleno = 1 (0x1), region = 75 }

</bundles_post_ra>
